<compile_context>
chip_gen: v7x
topology: tpu7x:2x2x1
jax: 0.10.0
libtpu: 0.0.40
codegen_flags: <defaults>
</compile_context>

<pallas_src>
import functools
import math

import jax
import jax.numpy as jnp
from jax import lax
from jax.experimental import pallas as pl
from jax.experimental.pallas import tpu as pltpu


# ----------------------------- plain-JAX glue --------------------------------

def _gaussian_kernel_1d(kernel_size: int, sigma: float):
    """Normalized 1D Gaussian taps (matches the common GaussianSmoothing impl)."""
    mean = (kernel_size - 1) / 2.0
    vals = [
        math.exp(-(((i - mean) / sigma) ** 2) / 2.0) / (sigma * math.sqrt(2.0 * math.pi))
        for i in range(kernel_size)
    ]
    s = sum(vals)
    return tuple(float(v / s) for v in vals)


def _timestep_embedding(t, dim, max_period=10000.0):
    """Standard sinusoidal diffusion timestep embedding, shape (B, dim)."""
    half = dim // 2
    freqs = jnp.exp(
        -math.log(max_period) * jnp.arange(half, dtype=jnp.float32) / float(half)
    )
    args = t.astype(jnp.float32)[:, None] * freqs[None, :]
    emb = jnp.concatenate([jnp.cos(args), jnp.sin(args)], axis=-1)
    if dim % 2:
        emb = jnp.concatenate([emb, jnp.zeros_like(emb[:, :1])], axis=-1)
    return emb


def _round_up(n, m):
    return ((n + m - 1) // m) * m


# ------------------------------ Pallas kernel --------------------------------

def _cond_embed_kernel(
    x_ref, pos_ref,
    ln1_g_ref, ln1_b_ref, w_lin_ref, b_lin_ref,
    ln2_g_ref, ln2_b_ref,
    wq_ref, bq_ref, wk_ref, bk_ref, wv_ref, bv_ref, wo_ref, bo_ref,
    hind_ref, hind_t_ref,
    tsum_ref,
    out_ref,
    *, head_dim, gk, eps=1e-5,
):
    TB = x_ref.shape[0]

    # ---- cat(mean, x) + positional embedding, tokens stacked on sublanes ----
    x = x_ref[...]                                      # (TB, 2, P)
    pos = pos_ref[...]                                  # (3, P)
    x0 = x[:, 0, :]                                     # (TB, P)
    x1 = x[:, 1, :]                                     # (TB, P)
    xm = 0.5 * (x0 + x1)                                # mean over the 2 tokens
    tok0 = xm + pos[0:1, :]
    tok1 = x0 + pos[1:2, :]
    tok2 = x1 + pos[2:3, :]
    xc = jnp.concatenate([tok0, tok1, tok2], axis=0)    # (3*TB, P)  token-major blocks

    # ---- lin = LayerNorm(P) -> Linear(P, T)  (one MXU matmul for all tokens) -
    mu = jnp.mean(xc, axis=-1, keepdims=True)
    var = jnp.mean(jnp.square(xc - mu), axis=-1, keepdims=True)
    xn = (xc - mu) * lax.rsqrt(var + eps)
    xn = xn * ln1_g_ref[...] + ln1_b_ref[...]
    h = jnp.dot(xn, w_lin_ref[...], preferred_element_type=jnp.float32) + b_lin_ref[...]  # (3*TB, T)

    # ---- attention pool: pre-norm, q from mean token, k/v from all tokens ----
    mu2 = jnp.mean(h, axis=-1, keepdims=True)
    var2 = jnp.mean(jnp.square(h - mu2), axis=-1, keepdims=True)
    hn = (h - mu2) * lax.rsqrt(var2 + eps)
    hn = hn * ln2_g_ref[...] + ln2_b_ref[...]                                              # (3*TB, T)

    q = jnp.dot(hn[0:TB, :], wq_ref[...], preferred_element_type=jnp.float32) + bq_ref[...]  # (TB, T)
    k = jnp.dot(hn, wk_ref[...], preferred_element_type=jnp.float32) + bk_ref[...]           # (3*TB, T)
    v = jnp.dot(hn, wv_ref[...], preferred_element_type=jnp.float32) + bv_ref[...]           # (3*TB, T)

    Hm = hind_ref[...]          # (T, NH)  head-indicator (block-diag selector)
    Hmt = hind_t_ref[...]       # (NH, T)
    scale = 1.0 / math.sqrt(head_dim)

    # per-head scores for each of the 3 kv tokens: (q*k_j) @ H sums within heads
    s_list = []
    for j in range(3):                                   # static, tiny
        kj = k[j * TB:(j + 1) * TB, :]                   # (TB, T) contiguous slice
        s_list.append(
            jnp.dot(q * kj, Hm, preferred_element_type=jnp.float32) * scale)   # (TB, NH)

    smax = jnp.maximum(jnp.maximum(s_list[0], s_list[1]), s_list[2])
    p_list = [jnp.exp(s - smax) for s in s_list]
    denom = p_list[0] + p_list[1] + p_list[2]
    inv = pl.reciprocal(denom, approx=True)              # EUP slot, essentially free

    pooled = jnp.zeros((TB, q.shape[-1]), jnp.float32)
    for j in range(3):
        pb = jnp.dot(p_list[j] * inv, Hmt, preferred_element_type=jnp.float32)  # (TB, T)
        vj = v[j * TB:(j + 1) * TB, :]
        pooled = pooled + pb * vj

    pooled = jnp.dot(pooled, wo_ref[...], preferred_element_type=jnp.float32) + bo_ref[...]  # (TB, T)

    # ---- Gaussian smoothing (reflect pad, 3 taps) + residual, folded center --
    T = pooled.shape[-1]
    r_left = pltpu.roll(pooled, 1, axis=1)               # r_left[i]  = pooled[i-1] (wrap at 0)
    r_right = pltpu.roll(pooled, T - 1, axis=1)          # r_right[i] = pooled[i+1] (wrap at T-1)
    lane = lax.broadcasted_iota(jnp.int32, pooled.shape, 1)
    x_left = jnp.where(lane == 0, r_right, r_left)       # reflect: left of 0 is pooled[1]
    x_right = jnp.where(lane == T - 1, r_left, r_right)  # reflect: right of T-1 is pooled[T-2]

    # out = pooled + smoothed + temb + tna   (center tap folded: 1 + gk[1])
    out = (1.0 + gk[1]) * pooled + gk[0] * x_left + gk[2] * x_right + tsum_ref[...]
    out_ref[...] = out.astype(out_ref.dtype)


# ------------------------------ wrapper ---------------------------------------

def conditional_embedding(params, x, t, t_na, *, attn_chans, noise_level=0.3):
    B, two, P = x.shape
    assert two == 2, "x must be (B, 2, pose_embed_dim)"
    T = params["w_lin"].shape[1]
    nheads = T // attn_chans
    assert nheads * attn_chans == T

    # Fused timestep-embedding stream (one (B, T) input instead of two (B,1,T)).
    temb = (
        _timestep_embedding(t, T)
        if t is not None
        else jnp.zeros((B, T), jnp.float32)
    )
    tsum = (temb + _timestep_embedding(t_na, T)).astype(jnp.float32)     # (B, T)

    # Head-indicator matrices for vectorized multi-head attention.
    d = jnp.arange(T, dtype=jnp.int32)
    hind = (d[:, None] // attn_chans
            == jnp.arange(nheads, dtype=jnp.int32)[None, :]).astype(jnp.float32)  # (T, NH)
    hind_t = hind.T                                                                 # (NH, T)

    gk = _gaussian_kernel_1d(3, noise_level)

    # Batch TB rows per grid step (amortizes per-step overhead, fattens MXU M).
    TB = min(256, _round_up(B, 8))
    Bp = _round_up(B, TB)
    pad = Bp - B
    x_p = x.astype(jnp.float32)
    tsum_p = tsum
    if pad:
        x_p = jnp.pad(x_p, ((0, pad), (0, 0), (0, 0)))
        tsum_p = jnp.pad(tsum_p, ((0, pad), (0, 0)))

    kernel = functools.partial(_cond_embed_kernel, head_dim=attn_chans, gk=gk)

    const2d = lambda i: (0, 0)  # noqa: E731

    # NOTE: demo shapes are tiny; for large T on v7x, consider single-buffering
    # the constant-index weight specs (pipeline_mode=pl.Buffered(1)) and/or
    # raising vmem_limit_bytes in CompilerParams.
    out = pl.pallas_call(
        kernel,
        out_shape=jax.ShapeDtypeStruct((Bp, T), jnp.float32),
        grid=(Bp // TB,),
        in_specs=[
            pl.BlockSpec((TB, 2, P), lambda i: (i, 0, 0)),  # x
            pl.BlockSpec((3, P), const2d),                  # positional_embedding
            pl.BlockSpec((1, P), const2d),                  # ln1 gamma
            pl.BlockSpec((1, P), const2d),                  # ln1 beta
            pl.BlockSpec((P, T), const2d),                  # lin weight
            pl.BlockSpec((1, T), const2d),                  # lin bias
            pl.BlockSpec((1, T), const2d),                  # ln2 gamma
            pl.BlockSpec((1, T), const2d),                  # ln2 beta
            pl.BlockSpec((T, T), const2d),                  # Wq
            pl.BlockSpec((1, T), const2d),                  # bq
            pl.BlockSpec((T, T), const2d),                  # Wk
            pl.BlockSpec((1, T), const2d),                  # bk
            pl.BlockSpec((T, T), const2d),                  # Wv
            pl.BlockSpec((1, T), const2d),                  # bv
            pl.BlockSpec((T, T), const2d),                  # Wo
            pl.BlockSpec((1, T), const2d),                  # bo
            pl.BlockSpec((T, nheads), const2d),             # head indicator
            pl.BlockSpec((nheads, T), const2d),             # head indicator (transposed)
            pl.BlockSpec((TB, T), lambda i: (i, 0)),        # fused timestep embeddings
        ],
        out_specs=pl.BlockSpec((TB, T), lambda i: (i, 0)),  # lane-dense (TB, T) output
        compiler_params=pltpu.CompilerParams(dimension_semantics=("parallel",)),
    )(
        x_p,
        params["pos_emb"],
        params["ln1_g"], params["ln1_b"],
        params["w_lin"], params["b_lin"],
        params["ln2_g"], params["ln2_b"],
        params["wq"], params["bq"],
        params["wk"], params["bk"],
        params["wv"], params["bv"],
        params["wo"], params["bo"],
        hind, hind_t,
        tsum_p,
    )
    return out[:B]   # (B, T), matches the module's squeeze(1)


# ------------------------------ demo -------------------------------------------

def _init_params(key, P, T):
    ks = jax.random.split(key, 8)
    scale_p = 1.0 / math.sqrt(P)
    scale_t = 1.0 / math.sqrt(T)
    return {
        "pos_emb": jax.random.normal(ks[0], (3, P), jnp.float32) / math.sqrt(P),
        "ln1_g": jnp.ones((1, P), jnp.float32),
        "ln1_b": jnp.zeros((1, P), jnp.float32),
        "w_lin": jax.random.normal(ks[1], (P, T), jnp.float32) * scale_p,
        "b_lin": jnp.zeros((1, T), jnp.float32),
        "ln2_g": jnp.ones((1, T), jnp.float32),
        "ln2_b": jnp.zeros((1, T), jnp.float32),
        "wq": jax.random.normal(ks[2], (T, T), jnp.float32) * scale_t,
        "bq": jnp.zeros((1, T), jnp.float32),
        "wk": jax.random.normal(ks[3], (T, T), jnp.float32) * scale_t,
        "bk": jnp.zeros((1, T), jnp.float32),
        "wv": jax.random.normal(ks[4], (T, T), jnp.float32) * scale_t,
        "bv": jnp.zeros((1, T), jnp.float32),
        "wo": jax.random.normal(ks[5], (T, T), jnp.float32) * scale_t,
        "bo": jnp.zeros((1, T), jnp.float32),
    }


if __name__ == "__main__":
    B = 20                # batch (exercises batching + padding to a sublane multiple)
    P = 32                # pose_embed_dim
    T = 128               # t_embed_dim (lane-dense output)
    ATTN_CHANS = 32       # -> 4 heads of width 32
    NOISE_LEVEL = 0.3

    key = jax.random.PRNGKey(0)
    kp, kx = jax.random.split(key)
    params = _init_params(kp, P, T)

    x = jax.random.normal(kx, (B, 2, P), jnp.float32)
    t = (jnp.arange(B, dtype=jnp.int32) * 3 + 1) % 100
    t_na = (jnp.arange(B, dtype=jnp.int32) * 7 + 2) % 100

    out = conditional_embedding(
        params, x, t, t_na, attn_chans=ATTN_CHANS, noise_level=NOISE_LEVEL
    )
    out = jax.block_until_ready(out)
    assert out.shape == (B, T), out.shape
    assert bool(jnp.all(jnp.isfinite(out)))
    print("KERNEL_OK")
</pallas_src>

<mosaic_0001>
module attributes {stable_mosaic.version = 11 : i64} {
  func.func @_cond_embed_kernel(%arg0: i32, %arg1: memref<24x2x32xf32, #tpu.memory_space<vmem>>, %arg2: memref<3x32xf32, #tpu.memory_space<vmem>>, %arg3: memref<1x32xf32, #tpu.memory_space<vmem>>, %arg4: memref<1x32xf32, #tpu.memory_space<vmem>>, %arg5: memref<32x128xf32, #tpu.memory_space<vmem>>, %arg6: memref<1x128xf32, #tpu.memory_space<vmem>>, %arg7: memref<1x128xf32, #tpu.memory_space<vmem>>, %arg8: memref<1x128xf32, #tpu.memory_space<vmem>>, %arg9: memref<128x128xf32, #tpu.memory_space<vmem>>, %arg10: memref<1x128xf32, #tpu.memory_space<vmem>>, %arg11: memref<128x128xf32, #tpu.memory_space<vmem>>, %arg12: memref<1x128xf32, #tpu.memory_space<vmem>>, %arg13: memref<128x128xf32, #tpu.memory_space<vmem>>, %arg14: memref<1x128xf32, #tpu.memory_space<vmem>>, %arg15: memref<128x128xf32, #tpu.memory_space<vmem>>, %arg16: memref<1x128xf32, #tpu.memory_space<vmem>>, %arg17: memref<128x4xf32, #tpu.memory_space<vmem>>, %arg18: memref<4x128xf32, #tpu.memory_space<vmem>>, %arg19: memref<24x128xf32, #tpu.memory_space<vmem>>, %arg20: memref<24x128xf32, #tpu.memory_space<vmem>>) attributes {dimension_semantics = [#tpu.dimension_semantics<parallel>], iteration_bounds = array<i64: 1>, scalar_prefetch = 0 : i64, scratch_operands = 0 : i64, tpu.core_type = #tpu.core_type<tc>, window_params = [{transform_indices = @transform_0, window_bounds = array<i64: 24, 2, 32>}, {pipeline_mode = #tpu.pipeline_mode<synchronous>, transform_indices = @transform_1, window_bounds = array<i64: 3, 32>}, {pipeline_mode = #tpu.pipeline_mode<synchronous>, transform_indices = @transform_2, window_bounds = array<i64: 1, 32>}, {pipeline_mode = #tpu.pipeline_mode<synchronous>, transform_indices = @transform_3, window_bounds = array<i64: 1, 32>}, {pipeline_mode = #tpu.pipeline_mode<synchronous>, transform_indices = @transform_4, window_bounds = array<i64: 32, 128>}, {pipeline_mode = #tpu.pipeline_mode<synchronous>, transform_indices = @transform_5, window_bounds = array<i64: 1, 128>}, {pipeline_mode = #tpu.pipeline_mode<synchronous>, transform_indices = @transform_6, window_bounds = array<i64: 1, 128>}, {pipeline_mode = #tpu.pipeline_mode<synchronous>, transform_indices = @transform_7, window_bounds = array<i64: 1, 128>}, {pipeline_mode = #tpu.pipeline_mode<synchronous>, transform_indices = @transform_8, window_bounds = array<i64: 128, 128>}, {pipeline_mode = #tpu.pipeline_mode<synchronous>, transform_indices = @transform_9, window_bounds = array<i64: 1, 128>}, {pipeline_mode = #tpu.pipeline_mode<synchronous>, transform_indices = @transform_10, window_bounds = array<i64: 128, 128>}, {pipeline_mode = #tpu.pipeline_mode<synchronous>, transform_indices = @transform_11, window_bounds = array<i64: 1, 128>}, {pipeline_mode = #tpu.pipeline_mode<synchronous>, transform_indices = @transform_12, window_bounds = array<i64: 128, 128>}, {pipeline_mode = #tpu.pipeline_mode<synchronous>, transform_indices = @transform_13, window_bounds = array<i64: 1, 128>}, {pipeline_mode = #tpu.pipeline_mode<synchronous>, transform_indices = @transform_14, window_bounds = array<i64: 128, 128>}, {pipeline_mode = #tpu.pipeline_mode<synchronous>, transform_indices = @transform_15, window_bounds = array<i64: 1, 128>}, {pipeline_mode = #tpu.pipeline_mode<synchronous>, transform_indices = @transform_16, window_bounds = array<i64: 128, 4>}, {pipeline_mode = #tpu.pipeline_mode<synchronous>, transform_indices = @transform_17, window_bounds = array<i64: 4, 128>}, {transform_indices = @transform_18, window_bounds = array<i64: 24, 128>}, {transform_indices = @transform_19, window_bounds = array<i64: 24, 128>}]} {
    %c0 = arith.constant 0 : index
    %c0_0 = arith.constant 0 : index
    %c0_1 = arith.constant 0 : index
    %0 = vector.load %arg1[%c0, %c0_0, %c0_1] : memref<24x2x32xf32, #tpu.memory_space<vmem>>, vector<24x2x32xf32>
    %c0_2 = arith.constant 0 : index
    %c0_3 = arith.constant 0 : index
    %1 = vector.load %arg2[%c0_2, %c0_3] : memref<3x32xf32, #tpu.memory_space<vmem>>, vector<3x32xf32>
    %2 = vector.extract_strided_slice %0 {offsets = [0, 0, 0], sizes = [24, 1, 32], strides = [1, 1, 1]} : vector<24x2x32xf32> to vector<24x1x32xf32>
    %3 = vector.shape_cast %2 : vector<24x1x32xf32> to vector<24x32xf32>
    %4 = vector.extract_strided_slice %0 {offsets = [0, 1, 0], sizes = [24, 1, 32], strides = [1, 1, 1]} : vector<24x2x32xf32> to vector<24x1x32xf32>
    %5 = vector.shape_cast %4 : vector<24x1x32xf32> to vector<24x32xf32>
    %6 = arith.addf %3, %5 : vector<24x32xf32>
    %cst = arith.constant 5.000000e-01 : f32
    %7 = vector.broadcast %cst : f32 to vector<24x32xf32>
    %8 = arith.mulf %7, %6 : vector<24x32xf32>
    %9 = vector.extract_strided_slice %1 {offsets = [0, 0], sizes = [1, 32], strides = [1, 1]} : vector<3x32xf32> to vector<1x32xf32>
    %10 = vector.broadcast %9 : vector<1x32xf32> to vector<24x32xf32>
    %11 = arith.addf %8, %10 : vector<24x32xf32>
    %12 = vector.extract_strided_slice %1 {offsets = [1, 0], sizes = [1, 32], strides = [1, 1]} : vector<3x32xf32> to vector<1x32xf32>
    %13 = vector.broadcast %12 : vector<1x32xf32> to vector<24x32xf32>
    %14 = arith.addf %3, %13 : vector<24x32xf32>
    %15 = vector.extract_strided_slice %1 {offsets = [2, 0], sizes = [1, 32], strides = [1, 1]} : vector<3x32xf32> to vector<1x32xf32>
    %16 = vector.broadcast %15 : vector<1x32xf32> to vector<24x32xf32>
    %17 = arith.addf %5, %16 : vector<24x32xf32>
    %18 = tpu.concatenate %11, %14, %17 in 0 : vector<24x32xf32>, vector<24x32xf32>, vector<24x32xf32> -> vector<72x32xf32>
    %cst_4 = arith.constant dense<0.000000e+00> : vector<72xf32>
    %19 = vector.multi_reduction <add>, %18, %cst_4 [1] : vector<72x32xf32> to vector<72xf32>
    %20 = vector.shape_cast %19 : vector<72xf32> to vector<72x1xf32>
    %cst_5 = arith.constant 3.200000e+01 : f32
    %21 = vector.broadcast %cst_5 : f32 to vector<72x1xf32>
    %22 = arith.divf %20, %21 : vector<72x1xf32>
    %23 = vector.broadcast %22 : vector<72x1xf32> to vector<72x32xf32>
    %24 = arith.subf %18, %23 : vector<72x32xf32>
    %25 = arith.mulf %24, %24 : vector<72x32xf32>
    %cst_6 = arith.constant dense<0.000000e+00> : vector<72xf32>
    %26 = vector.multi_reduction <add>, %25, %cst_6 [1] : vector<72x32xf32> to vector<72xf32>
    %27 = vector.shape_cast %26 : vector<72xf32> to vector<72x1xf32>
    %cst_7 = arith.constant 3.200000e+01 : f32
    %28 = vector.broadcast %cst_7 : f32 to vector<72x1xf32>
    %29 = arith.divf %27, %28 : vector<72x1xf32>
    %30 = vector.broadcast %22 : vector<72x1xf32> to vector<72x32xf32>
    %31 = arith.subf %18, %30 : vector<72x32xf32>
    %cst_8 = arith.constant 9.99999974E-6 : f32
    %32 = vector.broadcast %cst_8 : f32 to vector<72x1xf32>
    %33 = arith.addf %29, %32 : vector<72x1xf32>
    %34 = math.rsqrt %33 : vector<72x1xf32>
    %35 = vector.broadcast %34 : vector<72x1xf32> to vector<72x32xf32>
    %36 = arith.mulf %31, %35 : vector<72x32xf32>
    %c0_9 = arith.constant 0 : index
    %c0_10 = arith.constant 0 : index
    %37 = vector.load %arg3[%c0_9, %c0_10] : memref<1x32xf32, #tpu.memory_space<vmem>>, vector<1x32xf32>
    %38 = vector.broadcast %37 : vector<1x32xf32> to vector<72x32xf32>
    %39 = arith.mulf %36, %38 : vector<72x32xf32>
    %c0_11 = arith.constant 0 : index
    %c0_12 = arith.constant 0 : index
    %40 = vector.load %arg4[%c0_11, %c0_12] : memref<1x32xf32, #tpu.memory_space<vmem>>, vector<1x32xf32>
    %41 = vector.broadcast %40 : vector<1x32xf32> to vector<72x32xf32>
    %42 = arith.addf %39, %41 : vector<72x32xf32>
    %c0_13 = arith.constant 0 : index
    %c0_14 = arith.constant 0 : index
    %43 = vector.load %arg5[%c0_13, %c0_14] : memref<32x128xf32, #tpu.memory_space<vmem>>, vector<32x128xf32>
    %cst_15 = arith.constant dense<0.000000e+00> : vector<72x128xf32>
    %44 = tpu.matmul %42, %43, %cst_15 {dimension_numbers = #tpu.dot_dimension_numbers<[1], [0], [0], [1], [0, 0, 1, 1], [], []>} : vector<72x32xf32>, vector<32x128xf32>, vector<72x128xf32> -> vector<72x128xf32>
    %c0_16 = arith.constant 0 : index
    %c0_17 = arith.constant 0 : index
    %45 = vector.load %arg6[%c0_16, %c0_17] : memref<1x128xf32, #tpu.memory_space<vmem>>, vector<1x128xf32>
    %46 = vector.broadcast %45 : vector<1x128xf32> to vector<72x128xf32>
    %47 = arith.addf %44, %46 : vector<72x128xf32>
    %cst_18 = arith.constant dense<0.000000e+00> : vector<72xf32>
    %48 = vector.multi_reduction <add>, %47, %cst_18 [1] : vector<72x128xf32> to vector<72xf32>
    %49 = vector.shape_cast %48 : vector<72xf32> to vector<72x1xf32>
    %cst_19 = arith.constant 1.280000e+02 : f32
    %50 = vector.broadcast %cst_19 : f32 to vector<72x1xf32>
    %51 = arith.divf %49, %50 : vector<72x1xf32>
    %52 = vector.broadcast %51 : vector<72x1xf32> to vector<72x128xf32>
    %53 = arith.subf %47, %52 : vector<72x128xf32>
    %54 = arith.mulf %53, %53 : vector<72x128xf32>
    %cst_20 = arith.constant dense<0.000000e+00> : vector<72xf32>
    %55 = vector.multi_reduction <add>, %54, %cst_20 [1] : vector<72x128xf32> to vector<72xf32>
    %56 = vector.shape_cast %55 : vector<72xf32> to vector<72x1xf32>
    %cst_21 = arith.constant 1.280000e+02 : f32
    %57 = vector.broadcast %cst_21 : f32 to vector<72x1xf32>
    %58 = arith.divf %56, %57 : vector<72x1xf32>
    %59 = vector.broadcast %51 : vector<72x1xf32> to vector<72x128xf32>
    %60 = arith.subf %47, %59 : vector<72x128xf32>
    %cst_22 = arith.constant 9.99999974E-6 : f32
    %61 = vector.broadcast %cst_22 : f32 to vector<72x1xf32>
    %62 = arith.addf %58, %61 : vector<72x1xf32>
    %63 = math.rsqrt %62 : vector<72x1xf32>
    %64 = vector.broadcast %63 : vector<72x1xf32> to vector<72x128xf32>
    %65 = arith.mulf %60, %64 : vector<72x128xf32>
    %c0_23 = arith.constant 0 : index
    %c0_24 = arith.constant 0 : index
    %66 = vector.load %arg7[%c0_23, %c0_24] : memref<1x128xf32, #tpu.memory_space<vmem>>, vector<1x128xf32>
    %67 = vector.broadcast %66 : vector<1x128xf32> to vector<72x128xf32>
    %68 = arith.mulf %65, %67 : vector<72x128xf32>
    %c0_25 = arith.constant 0 : index
    %c0_26 = arith.constant 0 : index
    %69 = vector.load %arg8[%c0_25, %c0_26] : memref<1x128xf32, #tpu.memory_space<vmem>>, vector<1x128xf32>
    %70 = vector.broadcast %69 : vector<1x128xf32> to vector<72x128xf32>
    %71 = arith.addf %68, %70 : vector<72x128xf32>
    %72 = vector.extract_strided_slice %71 {offsets = [0, 0], sizes = [24, 128], strides = [1, 1]} : vector<72x128xf32> to vector<24x128xf32>
    %c0_27 = arith.constant 0 : index
    %c0_28 = arith.constant 0 : index
    %73 = vector.load %arg9[%c0_27, %c0_28] : memref<128x128xf32, #tpu.memory_space<vmem>>, vector<128x128xf32>
    %cst_29 = arith.constant dense<0.000000e+00> : vector<24x128xf32>
    %74 = tpu.matmul %72, %73, %cst_29 {dimension_numbers = #tpu.dot_dimension_numbers<[1], [0], [0], [1], [0, 0, 1, 1], [], []>} : vector<24x128xf32>, vector<128x128xf32>, vector<24x128xf32> -> vector<24x128xf32>
    %c0_30 = arith.constant 0 : index
    %c0_31 = arith.constant 0 : index
    %75 = vector.load %arg10[%c0_30, %c0_31] : memref<1x128xf32, #tpu.memory_space<vmem>>, vector<1x128xf32>
    %76 = vector.broadcast %75 : vector<1x128xf32> to vector<24x128xf32>
    %77 = arith.addf %74, %76 : vector<24x128xf32>
    %c0_32 = arith.constant 0 : index
    %c0_33 = arith.constant 0 : index
    %78 = vector.load %arg11[%c0_32, %c0_33] : memref<128x128xf32, #tpu.memory_space<vmem>>, vector<128x128xf32>
    %cst_34 = arith.constant dense<0.000000e+00> : vector<72x128xf32>
    %79 = tpu.matmul %71, %78, %cst_34 {dimension_numbers = #tpu.dot_dimension_numbers<[1], [0], [0], [1], [0, 0, 1, 1], [], []>} : vector<72x128xf32>, vector<128x128xf32>, vector<72x128xf32> -> vector<72x128xf32>
    %c0_35 = arith.constant 0 : index
    %c0_36 = arith.constant 0 : index
    %80 = vector.load %arg12[%c0_35, %c0_36] : memref<1x128xf32, #tpu.memory_space<vmem>>, vector<1x128xf32>
    %81 = vector.broadcast %80 : vector<1x128xf32> to vector<72x128xf32>
    %82 = arith.addf %79, %81 : vector<72x128xf32>
    %c0_37 = arith.constant 0 : index
    %c0_38 = arith.constant 0 : index
    %83 = vector.load %arg13[%c0_37, %c0_38] : memref<128x128xf32, #tpu.memory_space<vmem>>, vector<128x128xf32>
    %cst_39 = arith.constant dense<0.000000e+00> : vector<72x128xf32>
    %84 = tpu.matmul %71, %83, %cst_39 {dimension_numbers = #tpu.dot_dimension_numbers<[1], [0], [0], [1], [0, 0, 1, 1], [], []>} : vector<72x128xf32>, vector<128x128xf32>, vector<72x128xf32> -> vector<72x128xf32>
    %c0_40 = arith.constant 0 : index
    %c0_41 = arith.constant 0 : index
    %85 = vector.load %arg14[%c0_40, %c0_41] : memref<1x128xf32, #tpu.memory_space<vmem>>, vector<1x128xf32>
    %86 = vector.broadcast %85 : vector<1x128xf32> to vector<72x128xf32>
    %87 = arith.addf %84, %86 : vector<72x128xf32>
    %c0_42 = arith.constant 0 : index
    %c0_43 = arith.constant 0 : index
    %88 = vector.load %arg17[%c0_42, %c0_43] : memref<128x4xf32, #tpu.memory_space<vmem>>, vector<128x4xf32>
    %c0_44 = arith.constant 0 : index
    %c0_45 = arith.constant 0 : index
    %89 = vector.load %arg18[%c0_44, %c0_45] : memref<4x128xf32, #tpu.memory_space<vmem>>, vector<4x128xf32>
    %90 = vector.extract_strided_slice %82 {offsets = [0, 0], sizes = [24, 128], strides = [1, 1]} : vector<72x128xf32> to vector<24x128xf32>
    %91 = arith.mulf %77, %90 : vector<24x128xf32>
    %cst_46 = arith.constant dense<0.000000e+00> : vector<24x4xf32>
    %92 = tpu.matmul %91, %88, %cst_46 {dimension_numbers = #tpu.dot_dimension_numbers<[1], [0], [0], [1], [0, 0, 1, 1], [], []>} : vector<24x128xf32>, vector<128x4xf32>, vector<24x4xf32> -> vector<24x4xf32>
    %cst_47 = arith.constant 0.176776692 : f32
    %93 = vector.broadcast %cst_47 : f32 to vector<24x4xf32>
    %94 = arith.mulf %92, %93 : vector<24x4xf32>
    %95 = vector.extract_strided_slice %82 {offsets = [24, 0], sizes = [24, 128], strides = [1, 1]} : vector<72x128xf32> to vector<24x128xf32>
    %96 = arith.mulf %77, %95 : vector<24x128xf32>
    %cst_48 = arith.constant dense<0.000000e+00> : vector<24x4xf32>
    %97 = tpu.matmul %96, %88, %cst_48 {dimension_numbers = #tpu.dot_dimension_numbers<[1], [0], [0], [1], [0, 0, 1, 1], [], []>} : vector<24x128xf32>, vector<128x4xf32>, vector<24x4xf32> -> vector<24x4xf32>
    %cst_49 = arith.constant 0.176776692 : f32
    %98 = vector.broadcast %cst_49 : f32 to vector<24x4xf32>
    %99 = arith.mulf %97, %98 : vector<24x4xf32>
    %100 = vector.extract_strided_slice %82 {offsets = [48, 0], sizes = [24, 128], strides = [1, 1]} : vector<72x128xf32> to vector<24x128xf32>
    %101 = arith.mulf %77, %100 : vector<24x128xf32>
    %cst_50 = arith.constant dense<0.000000e+00> : vector<24x4xf32>
    %102 = tpu.matmul %101, %88, %cst_50 {dimension_numbers = #tpu.dot_dimension_numbers<[1], [0], [0], [1], [0, 0, 1, 1], [], []>} : vector<24x128xf32>, vector<128x4xf32>, vector<24x4xf32> -> vector<24x4xf32>
    %cst_51 = arith.constant 0.176776692 : f32
    %103 = vector.broadcast %cst_51 : f32 to vector<24x4xf32>
    %104 = arith.mulf %102, %103 : vector<24x4xf32>
    %105 = arith.maximumf %94, %99 : vector<24x4xf32>
    %106 = arith.maximumf %105, %104 : vector<24x4xf32>
    %107 = arith.subf %94, %106 : vector<24x4xf32>
    %108 = math.exp %107 : vector<24x4xf32>
    %109 = arith.subf %99, %106 : vector<24x4xf32>
    %110 = math.exp %109 : vector<24x4xf32>
    %111 = arith.subf %104, %106 : vector<24x4xf32>
    %112 = math.exp %111 : vector<24x4xf32>
    %113 = arith.addf %108, %110 : vector<24x4xf32>
    %114 = arith.addf %113, %112 : vector<24x4xf32>
    %115 = tpu.reciprocal %114 {approx = true} : vector<24x4xf32> -> vector<24x4xf32>
    %cst_52 = arith.constant 0.000000e+00 : f32
    %116 = vector.broadcast %cst_52 : f32 to vector<24x128xf32>
    %117 = arith.mulf %108, %115 : vector<24x4xf32>
    %cst_53 = arith.constant dense<0.000000e+00> : vector<24x128xf32>
    %118 = tpu.matmul %117, %89, %cst_53 {dimension_numbers = #tpu.dot_dimension_numbers<[1], [0], [0], [1], [0, 0, 1, 1], [], []>} : vector<24x4xf32>, vector<4x128xf32>, vector<24x128xf32> -> vector<24x128xf32>
    %119 = vector.extract_strided_slice %87 {offsets = [0, 0], sizes = [24, 128], strides = [1, 1]} : vector<72x128xf32> to vector<24x128xf32>
    %120 = arith.mulf %118, %119 : vector<24x128xf32>
    %121 = arith.addf %116, %120 : vector<24x128xf32>
    %122 = arith.mulf %110, %115 : vector<24x4xf32>
    %cst_54 = arith.constant dense<0.000000e+00> : vector<24x128xf32>
    %123 = tpu.matmul %122, %89, %cst_54 {dimension_numbers = #tpu.dot_dimension_numbers<[1], [0], [0], [1], [0, 0, 1, 1], [], []>} : vector<24x4xf32>, vector<4x128xf32>, vector<24x128xf32> -> vector<24x128xf32>
    %124 = vector.extract_strided_slice %87 {offsets = [24, 0], sizes = [24, 128], strides = [1, 1]} : vector<72x128xf32> to vector<24x128xf32>
    %125 = arith.mulf %123, %124 : vector<24x128xf32>
    %126 = arith.addf %121, %125 : vector<24x128xf32>
    %127 = arith.mulf %112, %115 : vector<24x4xf32>
    %cst_55 = arith.constant dense<0.000000e+00> : vector<24x128xf32>
    %128 = tpu.matmul %127, %89, %cst_55 {dimension_numbers = #tpu.dot_dimension_numbers<[1], [0], [0], [1], [0, 0, 1, 1], [], []>} : vector<24x4xf32>, vector<4x128xf32>, vector<24x128xf32> -> vector<24x128xf32>
    %129 = vector.extract_strided_slice %87 {offsets = [48, 0], sizes = [24, 128], strides = [1, 1]} : vector<72x128xf32> to vector<24x128xf32>
    %130 = arith.mulf %128, %129 : vector<24x128xf32>
    %131 = arith.addf %126, %130 : vector<24x128xf32>
    %c0_56 = arith.constant 0 : index
    %c0_57 = arith.constant 0 : index
    %132 = vector.load %arg15[%c0_56, %c0_57] : memref<128x128xf32, #tpu.memory_space<vmem>>, vector<128x128xf32>
    %cst_58 = arith.constant dense<0.000000e+00> : vector<24x128xf32>
    %133 = tpu.matmul %131, %132, %cst_58 {dimension_numbers = #tpu.dot_dimension_numbers<[1], [0], [0], [1], [0, 0, 1, 1], [], []>} : vector<24x128xf32>, vector<128x128xf32>, vector<24x128xf32> -> vector<24x128xf32>
    %c0_59 = arith.constant 0 : index
    %c0_60 = arith.constant 0 : index
    %134 = vector.load %arg16[%c0_59, %c0_60] : memref<1x128xf32, #tpu.memory_space<vmem>>, vector<1x128xf32>
    %135 = vector.broadcast %134 : vector<1x128xf32> to vector<24x128xf32>
    %136 = arith.addf %133, %135 : vector<24x128xf32>
    %c1_i32 = arith.constant 1 : i32
    %137 = tpu.dynamic_rotate %136 by %c1_i32 dim 1 : vector<24x128xf32>, i32 -> vector<24x128xf32>
    %c127_i32 = arith.constant 127 : i32
    %138 = tpu.dynamic_rotate %136 by %c127_i32 dim 1 : vector<24x128xf32>, i32 -> vector<24x128xf32>
    %139 = tpu.iota {dimensions = array<i32: 1>} : vector<24x128xi32>
    %c0_i32 = arith.constant 0 : i32
    %140 = vector.broadcast %c0_i32 : i32 to vector<24x128xi32>
    %141 = arith.cmpi eq, %139, %140 : vector<24x128xi32>
    %142 = arith.select %141, %138, %137 : vector<24x128xi1>, vector<24x128xf32>
    %c127_i32_61 = arith.constant 127 : i32
    %143 = vector.broadcast %c127_i32_61 : i32 to vector<24x128xi32>
    %144 = arith.cmpi eq, %139, %143 : vector<24x128xi32>
    %145 = arith.select %144, %137, %138 : vector<24x128xi1>, vector<24x128xf32>
    %cst_62 = arith.constant 1.99232745 : f32
    %146 = vector.broadcast %cst_62 : f32 to vector<24x128xf32>
    %147 = arith.mulf %146, %136 : vector<24x128xf32>
    %cst_63 = arith.constant 0.00383625878 : f32
    %148 = vector.broadcast %cst_63 : f32 to vector<24x128xf32>
    %149 = arith.mulf %148, %142 : vector<24x128xf32>
    %150 = arith.addf %147, %149 : vector<24x128xf32>
    %cst_64 = arith.constant 0.00383625878 : f32
    %151 = vector.broadcast %cst_64 : f32 to vector<24x128xf32>
    %152 = arith.mulf %151, %145 : vector<24x128xf32>
    %153 = arith.addf %150, %152 : vector<24x128xf32>
    %c0_65 = arith.constant 0 : index
    %c0_66 = arith.constant 0 : index
    %154 = vector.load %arg19[%c0_65, %c0_66] : memref<24x128xf32, #tpu.memory_space<vmem>>, vector<24x128xf32>
    %155 = arith.addf %153, %154 : vector<24x128xf32>
    %c0_67 = arith.constant 0 : index
    %c0_68 = arith.constant 0 : index
    %156 = vector.load %arg20[%c0_67, %c0_68] : memref<24x128xf32, #tpu.memory_space<vmem>>, vector<24x128xf32>
    tpu.vector_store %arg20[%c0_67, %c0_68], %155 {strides = array<i32>} : memref<24x128xf32, #tpu.memory_space<vmem>>, vector<24x128xf32>,
    return
  }
  func.func @transform_0(%arg0: i32) -> (i32, i32, i32) {
    %c0_i32 = arith.constant 0 : i32
    %c0_i32_0 = arith.constant 0 : i32
    %c0_i32_1 = arith.constant 0 : i32
    return %arg0, %c0_i32, %c0_i32_0 : i32, i32, i32
  }
  func.func @transform_1(%arg0: i32) -> (i32, i32) {
    %c0_i32 = arith.constant 0 : i32
    %c0_i32_0 = arith.constant 0 : i32
    %c0_i32_1 = arith.constant 0 : i32
    return %c0_i32, %c0_i32_0 : i32, i32
  }
  func.func @transform_2(%arg0: i32) -> (i32, i32) {
    %c0_i32 = arith.constant 0 : i32
    %c0_i32_0 = arith.constant 0 : i32
    %c0_i32_1 = arith.constant 0 : i32
    return %c0_i32, %c0_i32_0 : i32, i32
  }
  func.func @transform_3(%arg0: i32) -> (i32, i32) {
    %c0_i32 = arith.constant 0 : i32
    %c0_i32_0 = arith.constant 0 : i32
    %c0_i32_1 = arith.constant 0 : i32
    return %c0_i32, %c0_i32_0 : i32, i32
  }
  func.func @transform_4(%arg0: i32) -> (i32, i32) {
    %c0_i32 = arith.constant 0 : i32
    %c0_i32_0 = arith.constant 0 : i32
    %c0_i32_1 = arith.constant 0 : i32
    return %c0_i32, %c0_i32_0 : i32, i32
  }
  func.func @transform_5(%arg0: i32) -> (i32, i32) {
    %c0_i32 = arith.constant 0 : i32
    %c0_i32_0 = arith.constant 0 : i32
    %c0_i32_1 = arith.constant 0 : i32
    return %c0_i32, %c0_i32_0 : i32, i32
  }
  func.func @transform_6(%arg0: i32) -> (i32, i32) {
    %c0_i32 = arith.constant 0 : i32
    %c0_i32_0 = arith.constant 0 : i32
    %c0_i32_1 = arith.constant 0 : i32
    return %c0_i32, %c0_i32_0 : i32, i32
  }
  func.func @transform_7(%arg0: i32) -> (i32, i32) {
    %c0_i32 = arith.constant 0 : i32
    %c0_i32_0 = arith.constant 0 : i32
    %c0_i32_1 = arith.constant 0 : i32
    return %c0_i32, %c0_i32_0 : i32, i32
  }
  func.func @transform_8(%arg0: i32) -> (i32, i32) {
    %c0_i32 = arith.constant 0 : i32
    %c0_i32_0 = arith.constant 0 : i32
    %c0_i32_1 = arith.constant 0 : i32
    return %c0_i32, %c0_i32_0 : i32, i32
  }
  func.func @transform_9(%arg0: i32) -> (i32, i32) {
    %c0_i32 = arith.constant 0 : i32
    %c0_i32_0 = arith.constant 0 : i32
    %c0_i32_1 = arith.constant 0 : i32
    return %c0_i32, %c0_i32_0 : i32, i32
  }
  func.func @transform_10(%arg0: i32) -> (i32, i32) {
    %c0_i32 = arith.constant 0 : i32
    %c0_i32_0 = arith.constant 0 : i32
    %c0_i32_1 = arith.constant 0 : i32
    return %c0_i32, %c0_i32_0 : i32, i32
  }
  func.func @transform_11(%arg0: i32) -> (i32, i32) {
    %c0_i32 = arith.constant 0 : i32
    %c0_i32_0 = arith.constant 0 : i32
    %c0_i32_1 = arith.constant 0 : i32
    return %c0_i32, %c0_i32_0 : i32, i32
  }
  func.func @transform_12(%arg0: i32) -> (i32, i32) {
    %c0_i32 = arith.constant 0 : i32
    %c0_i32_0 = arith.constant 0 : i32
    %c0_i32_1 = arith.constant 0 : i32
    return %c0_i32, %c0_i32_0 : i32, i32
  }
  func.func @transform_13(%arg0: i32) -> (i32, i32) {
    %c0_i32 = arith.constant 0 : i32
    %c0_i32_0 = arith.constant 0 : i32
    %c0_i32_1 = arith.constant 0 : i32
    return %c0_i32, %c0_i32_0 : i32, i32
  }
  func.func @transform_14(%arg0: i32) -> (i32, i32) {
    %c0_i32 = arith.constant 0 : i32
    %c0_i32_0 = arith.constant 0 : i32
    %c0_i32_1 = arith.constant 0 : i32
    return %c0_i32, %c0_i32_0 : i32, i32
  }
  func.func @transform_15(%arg0: i32) -> (i32, i32) {
    %c0_i32 = arith.constant 0 : i32
    %c0_i32_0 = arith.constant 0 : i32
    %c0_i32_1 = arith.constant 0 : i32
    return %c0_i32, %c0_i32_0 : i32, i32
  }
  func.func @transform_16(%arg0: i32) -> (i32, i32) {
    %c0_i32 = arith.constant 0 : i32
    %c0_i32_0 = arith.constant 0 : i32
    %c0_i32_1 = arith.constant 0 : i32
    return %c0_i32, %c0_i32_0 : i32, i32
  }
  func.func @transform_17(%arg0: i32) -> (i32, i32) {
    %c0_i32 = arith.constant 0 : i32
    %c0_i32_0 = arith.constant 0 : i32
    %c0_i32_1 = arith.constant 0 : i32
    return %c0_i32, %c0_i32_0 : i32, i32
  }
  func.func @transform_18(%arg0: i32) -> (i32, i32) {
    %c0_i32 = arith.constant 0 : i32
    %c0_i32_0 = arith.constant 0 : i32
    return %arg0, %c0_i32 : i32, i32
  }
  func.func @transform_19(%arg0: i32) -> (i32, i32) {
    %c0_i32 = arith.constant 0 : i32
    %c0_i32_0 = arith.constant 0 : i32
    return %arg0, %c0_i32 : i32, i32
  }
}

</mosaic_0001>

<bundles_post_ra>
// kernel: tpu_custom_call.1
= control target key start
LH: loop header
LB: loop body
LE: loop exit
PB: predicated region body
PF: predicated region fallthrough
CT: control target
= control target key end

     0   :  { %s4667_s0 = inlined_call_operand.hbm [shape: f32[24,2,32], index: 0, kind: input, shape index: {}]   ;;  %s4668_s1 = inlined_call_operand.hbm [shape: f32[3,32], index: 1, kind: input, shape index: {}]   ;;  %s4669_s2 = inlined_call_operand.hbm [shape: f32[1,32], index: 2, kind: input, shape index: {}]   ;;  %s4670_s3 = inlined_call_operand.hbm [shape: f32[1,32], index: 3, kind: input, shape index: {}]   ;;  %s4671_s4 = inlined_call_operand.vmem [shape: f32[32,128], index: 4, kind: input, shape index: {}]   ;;  %s4672_s5 = inlined_call_operand.hbm [shape: f32[1,128], index: 5, kind: input, shape index: {}]   ;;  %s4673_s6 = inlined_call_operand.hbm [shape: f32[1,128], index: 6, kind: input, shape index: {}]   ;;  %s4674_s7 = inlined_call_operand.hbm [shape: f32[1,128], index: 7, kind: input, shape index: {}]   ;;  %s4675_s8 = inlined_call_operand.vmem [shape: f32[128,128], index: 8, kind: input, shape index: {}]   ;;  %s4676_s9 = inlined_call_operand.hbm [shape: f32[1,128], index: 9, kind: input, shape index: {}]   ;;  %s4677_s10 = inlined_call_operand.hbm [shape: f32[128,128], index: 10, kind: input, shape index: {}]   ;;  %s4678_s11 = inlined_call_operand.hbm [shape: f32[1,128], index: 11, kind: input, shape index: {}]   ;;  %s4679_s12 = inlined_call_operand.hbm [shape: f32[128,128], index: 12, kind: input, shape index: {}]   ;;  %s4680_s13 = inlined_call_operand.hbm [shape: f32[1,128], index: 13, kind: input, shape index: {}]   ;;  %s4681_s14 = inlined_call_operand.hbm [shape: f32[128,128], index: 14, kind: input, shape index: {}]   ;;  %s4682_s15 = inlined_call_operand.hbm [shape: f32[1,128], index: 15, kind: input, shape index: {}]   ;;  %s4683_s16 = inlined_call_operand.vmem [shape: f32[128,4], index: 16, kind: input, shape index: {}]   ;;  %s4684_s17 = inlined_call_operand.vmem [shape: f32[4,128], index: 17, kind: input, shape index: {}]   ;;  %s4685_s18 = inlined_call_operand.vmem [shape: f32[24,128], index: 18, kind: input, shape index: {}]   ;;  %s4686_s19 = inlined_call_operand.hbm [shape: f32[24,128], index: 19, kind: output, shape index: {}]  }
   0x1   :  { %4691 = sst [smem:[#allocation35_spill]] %s4667_s0 }
   0x2   :  { %4692 = sst [smem:[#allocation36_spill]] %s4668_s1 }
   0x3   :  { %4693 = sst [smem:[#allocation37_spill]] %s4669_s2 }
   0x4   :  { %4694 = sst [smem:[#allocation38_spill]] %s4670_s3 }
   0x5   :  { %24 = vsyncpa [#allocation3], 0 }
   0x6   :  { %25 = vsyncpa [#allocation6], 0 }
   0x7   :  { %26 = vsyncpa [#allocation9], 0 }
   0x8   :  { %27 = vsyncpa [#allocation12], 0 }
   0x9   :  { %28 = vsyncpa [#allocation15], 0 }
   0xa   :  { %29 = vsyncpa [#allocation18], 0 }
   0xb   :  { %30 = vsyncpa [#allocation21], 0 }
   0xc   :  { %31 = vsyncpa [#allocation24], 0 }
   0xd   :  { %32 = vsyncpa [#allocation4], 0  ;;  %s3462_s0 = smov [#allocation5]   ;;  %s3463_s20 = smov [#allocation8]  }
   0xe   :  { %s51_s30 = sshll.u32 %s3462_s0, 4  ;;  %s71_s21 = sshll.u32 %s3463_s20, 4  ;;  %s52_s30 = int_to_ptr.vmem [resolvable:$true] %s51_s30  ;;  %s72_s21 = int_to_ptr.vmem [resolvable:$true] %s71_s21 }
   0xf   :  { %s4695_s2 = sld [smem:[#allocation36_spill]] }
  0x15   :  { %s3114_s23 = scalar_lea.hbm %s4695_s2, 64 }
  0x16   :  { %p3115_p0 = scmp.ne.s32.totalorder %s4695_s2, %s3114_s23  ;;  %p3118_p1 = scmp.lt.u32.totalorder %s3114_s23, %s4695_s2 }
  0x18   :  { %p3120_p2 = pnand %p3118_p1, %p3115_p0 }
  0x1a   :  { %3123 = shalt.err (!%p3120_p2)
}
  0x1b   :  { %s3124_s27 = scalar_lea.vmem %s52_s30, 64  ;;  %p3129_p4 = scmp.lt.s32.totalorder %s52_s30, %s52_s30 }
  0x1c   :  { %p3125_p3 = scmp.ne.s32.totalorder %s52_s30, %s3124_s27  ;;  %p3130_p5 = scmp.lt.s32.totalorder %s3124_s27, %s3124_s27 }
  0x1e   :  { %p3131_p6 = por %p3130_p5, %p3129_p4 }
  0x20   :  { %p3132_p7 = pnand %p3131_p6, %p3125_p3 }
  0x22   :  { %3135 = shalt.err (!%p3132_p7)
}
  0x23   :  { %54 = dma.hbm_to_vmem [thread:$0]  %s4695_s2, 64, %s52_s30, [#allocation6]  }
  0x24   :  { %s4696_s1 = sld [smem:[#allocation38_spill]] }
  0x2a   :  { %s3136_s22 = scalar_lea.hbm %s4696_s1, 16 }
  0x2b   :  { %p3137_p8 = scmp.ne.s32.totalorder %s4696_s1, %s3136_s22  ;;  %p3140_p9 = scmp.lt.u32.totalorder %s3136_s22, %s4696_s1 }
  0x2d   :  { %p3142_p10 = pnand %p3140_p9, %p3137_p8 }
  0x2f   :  { %3145 = shalt.err (!%p3142_p10)
}
  0x30   :  { %s3146_s26 = scalar_lea.vmem %s72_s21, 16  ;;  %s3150_s27 = scalar_lea.vmem %s72_s21, 32 }
  0x31   :  { %p3147_p11 = scmp.ne.s32.totalorder %s72_s21, %s3146_s26  ;;  %p3151_p12 = scmp.lt.s32.totalorder %s72_s21, %s72_s21 }
  0x32   :  { %p3152_p13 = scmp.lt.s32.totalorder %s3150_s27, %s3146_s26 }
  0x34   :  { %p3153_p0 = por %p3152_p13, %p3151_p12 }
  0x36   :  { %p3154_p1 = pnand %p3153_p0, %p3147_p11 }
  0x38   :  { %3157 = shalt.err (!%p3154_p1)
}
  0x39   :  { %74 = dma.hbm_to_vmem [thread:$0]  %s4696_s1, 16, %s72_s21, [#allocation9]  }
  0x3a   :  { %s3464_s28 = smov [#allocation11]   ;;  %s3465_s0 = smov [#allocation14]  }
  0x3b   :  { %s93_s29 = sshll.u32 %s3464_s28, 4  ;;  %s115_s20 = sshll.u32 %s3465_s0, 4  ;;  %s94_s29 = int_to_ptr.vmem [resolvable:$true] %s93_s29  ;;  %s116_s20 = int_to_ptr.vmem [resolvable:$true] %s115_s20 }
  0x3c   :  { %s3158_s25 = scalar_lea.hbm %s4673_s6, 16 }
  0x3d   :  { %p3159_p2 = scmp.ne.s32.totalorder %s4673_s6, %s3158_s25  ;;  %p3162_p3 = scmp.lt.u32.totalorder %s3158_s25, %s4673_s6 }
  0x3f   :  { %p3164_p4 = pnand %p3162_p3, %p3159_p2 }
  0x41   :  { %3167 = shalt.err (!%p3164_p4)
}
  0x42   :  { %s3168_s21 = scalar_lea.vmem %s94_s29, 16  ;;  %s3172_s1 = scalar_lea.vmem %s94_s29, 32 }
  0x43   :  { %p3169_p5 = scmp.ne.s32.totalorder %s94_s29, %s3168_s21  ;;  %p3173_p6 = scmp.lt.s32.totalorder %s94_s29, %s94_s29 }
  0x44   :  { %p3174_p7 = scmp.lt.s32.totalorder %s3172_s1, %s3168_s21 }
  0x46   :  { %p3175_p8 = por %p3174_p7, %p3173_p6 }
  0x48   :  { %p3176_p9 = pnand %p3175_p8, %p3169_p5 }
  0x4a   :  { %3179 = shalt.err (!%p3176_p9)
}
  0x4b   :  { %96 = dma.hbm_to_vmem [thread:$0]  %s4673_s6, 16, %s94_s29, [#allocation12]  }
  0x4c   :  { %s3180_s22 = scalar_lea.hbm %s4676_s9, 16 }
  0x4d   :  { %p3181_p10 = scmp.ne.s32.totalorder %s4676_s9, %s3180_s22  ;;  %p3184_p11 = scmp.lt.u32.totalorder %s3180_s22, %s4676_s9 }
  0x4f   :  { %p3186_p12 = pnand %p3184_p11, %p3181_p10 }
  0x51   :  { %3189 = shalt.err (!%p3186_p12)
}
  0x52   :  { %s3190_s26 = scalar_lea.vmem %s116_s20, 16  ;;  %s3194_s27 = scalar_lea.vmem %s116_s20, 32 }
  0x53   :  { %p3191_p13 = scmp.ne.s32.totalorder %s116_s20, %s3190_s26  ;;  %p3195_p0 = scmp.lt.s32.totalorder %s116_s20, %s116_s20 }
  0x54   :  { %p3196_p1 = scmp.lt.s32.totalorder %s3194_s27, %s3190_s26 }
  0x56   :  { %p3197_p2 = por %p3196_p1, %p3195_p0 }
  0x58   :  { %p3198_p3 = pnand %p3197_p2, %p3191_p13 }
  0x5a   :  { %3201 = shalt.err (!%p3198_p3)
}
  0x5b   :  { %118 = dma.hbm_to_vmem [thread:$0]  %s4676_s9, 16, %s116_s20, [#allocation15]  }
  0x5c   :  { %s3466_s21 = smov [#allocation17]   ;;  %s3467_s30 = smov [#allocation20]  }
  0x5d   :  { %s137_s1 = sshll.u32 %s3466_s21, 4  ;;  %s159_s2 = sshll.u32 %s3467_s30, 4  ;;  %s138_s1 = int_to_ptr.vmem [resolvable:$true] %s137_s1  ;;  %s160_s2 = int_to_ptr.vmem [resolvable:$true] %s159_s2 }
  0x5e   :  { %s3202_s22 = scalar_lea.hbm %s4678_s11, 16 }
  0x5f   :  { %p3203_p4 = scmp.ne.s32.totalorder %s4678_s11, %s3202_s22  ;;  %p3206_p5 = scmp.lt.u32.totalorder %s3202_s22, %s4678_s11 }
  0x61   :  { %p3208_p6 = pnand %p3206_p5, %p3203_p4 }
  0x63   :  { %3211 = shalt.err (!%p3208_p6)
}
  0x64   :  { %s3212_s9 = scalar_lea.vmem %s138_s1, 16  ;;  %s3216_s20 = scalar_lea.vmem %s138_s1, 32 }
  0x65   :  { %p3213_p7 = scmp.ne.s32.totalorder %s138_s1, %s3212_s9  ;;  %p3217_p8 = scmp.lt.s32.totalorder %s138_s1, %s138_s1 }
  0x66   :  { %p3218_p9 = scmp.lt.s32.totalorder %s3216_s20, %s3212_s9 }
  0x68   :  { %p3219_p10 = por %p3218_p9, %p3217_p8 }
  0x6a   :  { %p3220_p11 = pnand %p3219_p10, %p3213_p7 }
  0x6c   :  { %3223 = shalt.err (!%p3220_p11)
}
  0x6d   :  { %140 = dma.hbm_to_vmem [thread:$0]  %s4678_s11, 16, %s138_s1, [#allocation18]  }
  0x6e   :  { %s3224_s21 = scalar_lea.hbm %s4680_s13, 16 }
  0x6f   :  { %p3225_p12 = scmp.ne.s32.totalorder %s4680_s13, %s3224_s21  ;;  %p3228_p13 = scmp.lt.u32.totalorder %s3224_s21, %s4680_s13 }
  0x71   :  { %p3230_p0 = pnand %p3228_p13, %p3225_p12 }
  0x73   :  { %3233 = shalt.err (!%p3230_p0)
}
  0x74   :  { %s3234_s24 = scalar_lea.vmem %s160_s2, 16  ;;  %s3238_s25 = scalar_lea.vmem %s160_s2, 32 }
  0x75   :  { %p3235_p1 = scmp.ne.s32.totalorder %s160_s2, %s3234_s24  ;;  %p3239_p2 = scmp.lt.s32.totalorder %s160_s2, %s160_s2 }
  0x76   :  { %p3240_p3 = scmp.lt.s32.totalorder %s3238_s25, %s3234_s24 }
  0x78   :  { %p3241_p4 = por %p3240_p3, %p3239_p2 }
  0x7a   :  { %p3242_p5 = pnand %p3241_p4, %p3235_p1 }
  0x7c   :  { %3245 = shalt.err (!%p3242_p5)
}
  0x7d   :  { %162 = dma.hbm_to_vmem [thread:$0]  %s4680_s13, 16, %s160_s2, [#allocation21]  }
  0x7e   :  { %s3468_s23 = smov [#allocation2]   ;;  %s4697_s26 = sld [smem:[#allocation35_spill]] }
  0x7f   :  { %s38_s3 = sshll.u32 %s3468_s23, 4  ;;  %s39_s3 = int_to_ptr.vmem [resolvable:$true] %s38_s3 }
  0x84   :  { %s3246_s27 = scalar_lea.hbm %s4697_s26, 768 }
  0x85   :  { %p3247_p6 = scmp.ne.s32.totalorder %s4697_s26, %s3246_s27  ;;  %p3250_p7 = scmp.lt.u32.totalorder %s3246_s27, %s4697_s26 }
  0x87   :  { %p3252_p8 = pnand %p3250_p7, %p3247_p6 }
  0x89   :  { %3255 = shalt.err (!%p3252_p8)
}
  0x8a   :  { %s3256_s28 = scalar_lea.vmem %s39_s3, 768  ;;  %p3261_p10 = scmp.lt.s32.totalorder %s39_s3, %s39_s3 }
  0x8b   :  { %p3257_p9 = scmp.ne.s32.totalorder %s39_s3, %s3256_s28  ;;  %p3262_p11 = scmp.lt.s32.totalorder %s3256_s28, %s3256_s28 }
  0x8d   :  { %p3263_p12 = por %p3262_p11, %p3261_p10 }
  0x8f   :  { %p3264_p13 = pnand %p3263_p12, %p3257_p9 }
  0x91   :  { %3267 = shalt.err (!%p3264_p13)
}
  0x92   :  { %s3469_s13 = smov 32   ;;  %s3470_s2 = smov 2  }
  0x93   :  { %44 = dma.hbm_to_vmem [thread:$0]  %s4697_s26, 768, %s39_s3, [#allocation3], %s3469_s13, %s3469_s13, %s3470_s2  }
  0x94   :  { %s3471_s24 = smov [#allocation7]   ;;  %s3472_s11 = smov [#allocation10]  }
  0x95   :  { %s61_s25 = sshll.u32 %s3471_s24, 4  ;;  %s83_s1 = sshll.u32 %s3472_s11, 4  ;;  %s62_s25 = int_to_ptr.vmem [resolvable:$true] %s61_s25  ;;  %s84_s1 = int_to_ptr.vmem [resolvable:$true] %s83_s1 }
  0x96   :  { %s4698_s20 = sld [smem:[#allocation37_spill]] }
  0x9c   :  { %s3268_s27 = scalar_lea.hbm %s4698_s20, 16 }
  0x9d   :  { %p3269_p0 = scmp.ne.s32.totalorder %s4698_s20, %s3268_s27  ;;  %p3272_p1 = scmp.lt.u32.totalorder %s3268_s27, %s4698_s20 }
  0x9f   :  { %p3274_p2 = pnand %p3272_p1, %p3269_p0 }
  0xa1   :  { %3277 = shalt.err (!%p3274_p2)
}
  0xa2   :  { %s3278_s3 = scalar_lea.vmem %s62_s25, 16  ;;  %s3282_s26 = scalar_lea.vmem %s62_s25, 32 }
  0xa3   :  { %p3279_p3 = scmp.ne.s32.totalorder %s62_s25, %s3278_s3  ;;  %p3283_p4 = scmp.lt.s32.totalorder %s62_s25, %s62_s25 }
  0xa4   :  { %p3284_p5 = scmp.lt.s32.totalorder %s3282_s26, %s3278_s3 }
  0xa6   :  { %p3285_p6 = por %p3284_p5, %p3283_p4 }
  0xa8   :  { %p3286_p7 = pnand %p3285_p6, %p3279_p3 }
  0xaa   :  { %3289 = shalt.err (!%p3286_p7)
}
  0xab   :  { %64 = dma.hbm_to_vmem [thread:$0]  %s4698_s20, 16, %s62_s25, [#allocation6]  }
  0xac   :  { %s3290_s22 = scalar_lea.hbm %s4672_s5, 16 }
  0xad   :  { %p3291_p8 = scmp.ne.s32.totalorder %s4672_s5, %s3290_s22  ;;  %p3294_p9 = scmp.lt.u32.totalorder %s3290_s22, %s4672_s5 }
  0xaf   :  { %p3296_p10 = pnand %p3294_p9, %p3291_p8 }
  0xb1   :  { %3299 = shalt.err (!%p3296_p10)
}
  0xb2   :  { %s3300_s27 = scalar_lea.vmem %s84_s1, 16  ;;  %s3304_s6 = scalar_lea.vmem %s84_s1, 32 }
  0xb3   :  { %p3301_p11 = scmp.ne.s32.totalorder %s84_s1, %s3300_s27  ;;  %p3305_p12 = scmp.lt.s32.totalorder %s84_s1, %s84_s1 }
  0xb4   :  { %p3306_p13 = scmp.lt.s32.totalorder %s3304_s6, %s3300_s27 }
  0xb6   :  { %p3307_p0 = por %p3306_p13, %p3305_p12 }
  0xb8   :  { %p3308_p1 = pnand %p3307_p0, %p3301_p11 }
  0xba   :  { %3311 = shalt.err (!%p3308_p1)
}
  0xbb   :  { %86 = dma.hbm_to_vmem [thread:$0]  %s4672_s5, 16, %s84_s1, [#allocation9]  }
  0xbc   :  { %s3473_s29 = smov [#allocation13]   ;;  %s3474_s30 = smov [#allocation16]  }
  0xbd   :  { %s103_s21 = sshll.u32 %s3473_s29, 4  ;;  %s124_s3 = sshll.u32 %s3474_s30, 4  ;;  %s104_s21 = int_to_ptr.vmem [resolvable:$true] %s103_s21  ;;  %s125_s3 = int_to_ptr.vmem [resolvable:$true] %s124_s3 }
  0xbe   :  { %s3312_s13 = scalar_lea.hbm %s4674_s7, 16 }
  0xbf   :  { %p3313_p2 = scmp.ne.s32.totalorder %s4674_s7, %s3312_s13  ;;  %p3316_p3 = scmp.lt.u32.totalorder %s3312_s13, %s4674_s7 }
  0xc1   :  { %p3318_p4 = pnand %p3316_p3, %p3313_p2 }
  0xc3   :  { %3321 = shalt.err (!%p3318_p4)
}
  0xc4   :  { %s3322_s5 = scalar_lea.vmem %s104_s21, 16  ;;  %s3326_s1 = scalar_lea.vmem %s104_s21, 32 }
  0xc5   :  { %p3323_p5 = scmp.ne.s32.totalorder %s104_s21, %s3322_s5  ;;  %p3327_p6 = scmp.lt.s32.totalorder %s104_s21, %s104_s21 }
  0xc6   :  { %p3328_p7 = scmp.lt.s32.totalorder %s3326_s1, %s3322_s5 }
  0xc8   :  { %p3329_p8 = por %p3328_p7, %p3327_p6 }
  0xca   :  { %p3330_p9 = pnand %p3329_p8, %p3323_p5 }
  0xcc   :  { %3333 = shalt.err (!%p3330_p9)
}
  0xcd   :  { %106 = dma.hbm_to_vmem [thread:$0]  %s4674_s7, 16, %s104_s21, [#allocation12]  }
  0xce   :  { %s3334_s6 = scalar_lea.hbm %s4677_s10, 2048 }
  0xcf   :  { %p3335_p10 = scmp.ne.s32.totalorder %s4677_s10, %s3334_s6  ;;  %p3338_p11 = scmp.lt.u32.totalorder %s3334_s6, %s4677_s10 }
  0xd1   :  { %p3340_p12 = pnand %p3338_p11, %p3335_p10 }
  0xd3   :  { %3343 = shalt.err (!%p3340_p12)
}
  0xd4   :  { %s3344_s26 = scalar_lea.vmem %s125_s3, 2048  ;;  %p3349_p0 = scmp.lt.s32.totalorder %s125_s3, %s125_s3 }
  0xd5   :  { %p3345_p13 = scmp.ne.s32.totalorder %s125_s3, %s3344_s26  ;;  %p3350_p1 = scmp.lt.s32.totalorder %s3344_s26, %s3344_s26 }
  0xd7   :  { %p3351_p2 = por %p3350_p1, %p3349_p0 }
  0xd9   :  { %p3352_p3 = pnand %p3351_p2, %p3345_p13 }
  0xdb   :  { %3355 = shalt.err (!%p3352_p3)
}
  0xdc   :  { %s3475_s7 = smov 128   ;;  %s3476_s21 = smov 8  }
  0xdd   :  { %130 = dma.hbm_to_vmem [thread:$0]  %s4677_s10, 2048, %s125_s3, [#allocation15], %s3475_s7, %s3475_s7, %s3476_s21  }
  0xde   :  { %s3477_s2 = smov [#allocation19]   ;;  %s3478_s22 = smov [#allocation22]  }
  0xdf   :  { %s146_s0 = sshll.u32 %s3477_s2, 4  ;;  %s168_s24 = sshll.u32 %s3478_s22, 4  ;;  %s147_s0 = int_to_ptr.vmem [resolvable:$true] %s146_s0  ;;  %s169_s24 = int_to_ptr.vmem [resolvable:$true] %s168_s24 }
  0xe0   :  { %s3356_s11 = scalar_lea.hbm %s4679_s12, 2048 }
  0xe1   :  { %p3357_p4 = scmp.ne.s32.totalorder %s4679_s12, %s3356_s11  ;;  %p3360_p5 = scmp.lt.u32.totalorder %s3356_s11, %s4679_s12 }
  0xe3   :  { %p3362_p6 = pnand %p3360_p5, %p3357_p4 }
  0xe5   :  { %3365 = shalt.err (!%p3362_p6)
}
  0xe6   :  { %s3366_s10 = scalar_lea.vmem %s147_s0, 2048  ;;  %p3371_p8 = scmp.lt.s32.totalorder %s147_s0, %s147_s0 }
  0xe7   :  { %p3367_p7 = scmp.ne.s32.totalorder %s147_s0, %s3366_s10  ;;  %p3372_p9 = scmp.lt.s32.totalorder %s3366_s10, %s3366_s10 }
  0xe9   :  { %p3373_p10 = por %p3372_p9, %p3371_p8 }
  0xeb   :  { %p3374_p11 = pnand %p3373_p10, %p3367_p7 }
  0xed   :  { %3377 = shalt.err (!%p3374_p11)
}
  0xee   :  { %152 = dma.hbm_to_vmem [thread:$0]  %s4679_s12, 2048, %s147_s0, [#allocation18], %s3475_s7, %s3475_s7, %s3476_s21  }
  0xef   :  { %s3378_s30 = scalar_lea.hbm %s4681_s14, 2048 }
  0xf0   :  { %p3379_p12 = scmp.ne.s32.totalorder %s4681_s14, %s3378_s30  ;;  %p3382_p13 = scmp.lt.u32.totalorder %s3378_s30, %s4681_s14 }
  0xf2   :  { %p3384_p0 = pnand %p3382_p13, %p3379_p12 }
  0xf4   :  { %3387 = shalt.err (!%p3384_p0)
}
  0xf5   :  { %s3388_s22 = scalar_lea.vmem %s169_s24, 2048  ;;  %p3393_p2 = scmp.lt.s32.totalorder %s169_s24, %s169_s24 }
  0xf6   :  { %p3389_p1 = scmp.ne.s32.totalorder %s169_s24, %s3388_s22  ;;  %p3394_p3 = scmp.lt.s32.totalorder %s3388_s22, %s3388_s22 }
  0xf8   :  { %p3395_p4 = por %p3394_p3, %p3393_p2 }
  0xfa   :  { %p3396_p5 = pnand %p3395_p4, %p3389_p1 }
  0xfc   :  { %3399 = shalt.err (!%p3396_p5)
}
  0xfd   :  { %174 = dma.hbm_to_vmem [thread:$0]  %s4681_s14, 2048, %s169_s24, [#allocation21], %s3475_s7, %s3475_s7, %s3476_s21  }
  0xfe   :  { %s3479_s5 = smov [#allocation23]   ;;  %s3400_s9 = scalar_lea.hbm %s4682_s15, 16 }
  0xff   :  { %s181_s1 = sshll.u32 %s3479_s5, 4  ;;  %p3401_p6 = scmp.ne.s32.totalorder %s4682_s15, %s3400_s9  ;;  %s182_s1 = int_to_ptr.vmem [resolvable:$true] %s181_s1 }
 0x100   :  { %p3404_p7 = scmp.lt.u32.totalorder %s3400_s9, %s4682_s15 }
 0x102   :  { %p3406_p8 = pnand %p3404_p7, %p3401_p6 }
 0x104   :  { %3409 = shalt.err (!%p3406_p8)
}
 0x105   :  { %s3410_s25 = scalar_lea.vmem %s182_s1, 16  ;;  %s3414_s14 = scalar_lea.vmem %s182_s1, 32 }
 0x106   :  { %p3411_p9 = scmp.ne.s32.totalorder %s182_s1, %s3410_s25  ;;  %p3415_p10 = scmp.lt.s32.totalorder %s182_s1, %s182_s1 }
 0x107   :  { %p3416_p11 = scmp.lt.s32.totalorder %s3414_s14, %s3410_s25 }
 0x109   :  { %p3417_p12 = por %p3416_p11, %p3415_p10 }
 0x10b   :  { %p3418_p13 = pnand %p3417_p12, %p3411_p9 }
 0x10d   :  { %3421 = shalt.err (!%p3418_p13)
}
 0x10e   :  { %184 = dma.hbm_to_vmem [thread:$0]  %s4682_s15, 16, %s182_s1, [#allocation24]  }
 0x10f   :  { %3444 = dma.done.wait [#allocation3], 768  }
 0x110   :  { %3445 = vsyncadd [#allocation3], 4294966528 }
 0x111   :  { %3446 = dma.done.wait [#allocation6], 80  }
 0x112   :  { %3447 = vsyncadd [#allocation6], 4294967216 }
 0x113   :  { %3448 = dma.done.wait [#allocation9], 32  }
 0x114   :  { %3449 = vsyncadd [#allocation9], 4294967264 }
 0x115   :  { %3450 = dma.done.wait [#allocation12], 32  }
 0x116   :  { %3451 = vsyncadd [#allocation12], 4294967264 }
 0x117   :  { %3452 = dma.done.wait [#allocation15], 2064  }
 0x118   :  { %3453 = vsyncadd [#allocation15], 4294965232 }
 0x119   :  { %3454 = dma.done.wait [#allocation18], 2064  }
 0x11a   :  { %3455 = vsyncadd [#allocation18], 4294965232 }
 0x11b   :  { %3456 = dma.done.wait [#allocation21], 2064  }
 0x11c   :  { %3457 = vsyncadd [#allocation21], 4294965232 }
 0x11d   :  { %3458 = dma.done.wait [#allocation24], 16  }
 0x11e   :  { %3459 = vsyncadd [#allocation24], 4294967280  ;;  %v378_v0 = vlaneseq  ;;  %v3767_v3 = vld [vmem:[#allocation2] sm:$0x3]  ;;  %v3769_v4 = vld [vmem:[#allocation2 + $0x2] sm:$0x3] }
 0x11f   :  { %v3771_v5 = vld [vmem:[#allocation2 + $0x4] sm:$0x3]  ;;  %v3773_v6 = vld [vmem:[#allocation2 + $0x6] sm:$0x3]  ;;  %v3775_v7 = vld [vmem:[#allocation2 + $0x8] sm:$0x3] }
 0x120   :  { %v3764_v1 = vshrl.u32 %v378_v0, 7  ;;  %v3777_v8 = vld [vmem:[#allocation2 + $0xa] sm:$0x3]  ;;  %v3779_v9 = vld [vmem:[#allocation2 + $0xc] sm:$0x3]  ;;  %v282_v13 = vrot.slane %v3767_v3, 1 }
 0x121   :  { %v3781_v10 = vld [vmem:[#allocation2 + $0xe] sm:$0x3]  ;;  %v283_v14 = vrot.slane %v3769_v4, 1  ;;  %v284_v15 = vrot.slane %v3771_v5, 1  ;;  %v285_v16 = vrot.slane %v3773_v6, 1  ;;  %v286_v18 = vrot.slane %v3775_v7, 1 }
 0x122   :  { %v380_v2 = vsub.s32 0, %v3764_v1  ;;  %v408_v11 = vsub.s32 1, %v3764_v1  ;;  %v436_v12 = vsub.s32 2, %v3764_v1  ;;  %v3789_v17 = vld [vmem:[#allocation5] sm:$0x7]  ;;  %v287_v19 = vrot.slane %v3777_v8, 1 }
 0x123   :  { %v288_v20 = vrot.slane %v3779_v9, 1  ;;  %v289_v21 = vrot.slane %v3781_v10, 1  ;;  %vm487_vm0 = vcmask 1041409   ;;  %v330_v22 = vadd.f32 %v282_v13, %v3767_v3  ;;  %v3799_v26 = vld [vmem:[#allocation2 + $0x20] sm:$0x3]  ;;  %s3484_s20 = smov 1  }
 0x124   :  { %v331_v23 = vadd.f32 %v283_v14, %v3769_v4  ;;  %v332_v24 = vadd.f32 %v284_v15, %v3771_v5  ;;  %v333_v25 = vadd.f32 %v285_v16, %v3773_v6  ;;  %vm490_vm1 = vcmask 1042434   ;;  %v3801_v27 = vld [vmem:[#allocation2 + $0x22] sm:$0x3]  ;;  %v3803_v28 = vld [vmem:[#allocation2 + $0x24] sm:$0x3]  ;;  %s3485_s2 = smov [#allocation25]  }
 0x125   :  { %v334_v29 = vadd.f32 %v286_v18, %v3775_v7  ;;  %v335_v30 = vadd.f32 %v287_v19, %v3777_v8  ;;  %v336_v31 = vadd.f32 %v288_v20, %v3779_v9  ;;  %v337_v32 = vadd.f32 %v289_v21, %v3781_v10  ;;  %v3809_v33 = vld [vmem:[#allocation2 + $0x26] sm:$0x3]  ;;  %v3811_v34 = vld [vmem:[#allocation2 + $0x28] sm:$0x3]  ;;  %v3813_v35 = vld [vmem:[#allocation2 + $0x2a] sm:$0x3] }
 0x126   :  { %vm493_vm2 = vcmask 1043459   ;;  %v354_v36 = vmul.f32 0.5, %v330_v22  ;;  %v355_v37 = vmul.f32 0.5, %v331_v23  ;;  %v356_v38 = vmul.f32 0.5, %v332_v24  ;;  %v3815_v40 = vld [vmem:[#allocation2 + $0x2c] sm:$0x3] }
 0x127   :  { %v357_v39 = vmul.f32 0.5, %v333_v25  ;;  %vm496_vm3 = vcmask 1044484   ;;  %v358_v41 = vmul.f32 0.5, %v334_v29  ;;  %v359_v42 = vmul.f32 0.5, %v335_v30  ;;  %v3823_v49 = vld [vmem:[#allocation2 + $0x2e] sm:$0x3] }
 0x128   :  { %v360_v43 = vmul.f32 0.5, %v336_v31  ;;  %v361_v44 = vmul.f32 0.5, %v337_v32  ;;  %vm499_vm4 = vcmask 1045509   ;;  %v3818_v45 = vrot.slane %v3789_v17, %v380_v2  ;;  %s2246_s22 = sshll.u32 %s3485_s2, 4  ;;  %s2247_s22 = int_to_ptr.vmem [resolvable:$true] %s2246_s22 }
 0x129   :  { %vm502_vm5 = vcmask 1046534   ;;  %v298_v46 = vrot.slane %v3799_v26, 1  ;;  %v299_v47 = vrot.slane %v3801_v27, 1  ;;  %v300_v48 = vrot.slane %v3803_v28, 1  ;;  %p3427_p1 = scmp.lt.s32.totalorder %s2247_s22, %s2247_s22 }
 0x12a   :  { %vm505_vm6 = vcmask 1047559   ;;  %v301_v50 = vrot.slane %v3809_v33, 1  ;;  %v302_v51 = vrot.slane %v3811_v34, 1  ;;  %v303_v52 = vrot.slane %v3813_v35, 1 }
 0x12b   :  { %v304_v53 = vrot.slane %v3815_v40, 1  ;;  %v382_v54 = vadd.f32 %v3818_v45, %v354_v36  ;;  %v383_v55 = vadd.f32 %v3818_v45, %v355_v37  ;;  %v384_v56 = vadd.f32 %v3818_v45, %v356_v38 }
 0x12c   :  { %v385_v57 = vadd.f32 %v3818_v45, %v357_v39  ;;  %vm676_vm7 = vcmask 261120   ;;  %v386_v58 = vadd.f32 %v3818_v45, %v358_v41  ;;  %v387_v59 = vadd.f32 %v3818_v45, %v359_v42 }
 0x12d   :  { %v388_v60 = vadd.f32 %v3818_v45, %v360_v43  ;;  %v389_v61 = vadd.f32 %v3818_v45, %v361_v44  ;;  %v486_v62 = vrot.slane %v383_v55, 7  ;;  %v489_v63 = vrot.slane %v384_v56, 6 }
 0x12e   :  { %v492_v2 = vrot.slane %v385_v57, 5  ;;  %v305_v13 = vrot.slane %v3823_v49, 1  ;;  %v495_v14 = vrot.slane %v386_v58, 4  ;;  %v498_v15 = vrot.slane %v387_v59, 3  ;;  %v3862_v57 = vld [vmem:[#allocation2 + $0x12] sm:$0x3] }
 0x12f   :  { %v501_v16 = vrot.slane %v388_v60, 2  ;;  %v504_v18 = vrot.slane %v389_v61, 1  ;;  %v488_v19 = vsel %vm487_vm0, %v486_v62, %v382_v54  ;;  %v346_v20 = vadd.f32 %v298_v46, %v3799_v26  ;;  %v3864_v58 = vld [vmem:[#allocation2 + $0x14] sm:$0x3]  ;;  %v3866_v59 = vld [vmem:[#allocation2 + $0x16] sm:$0x3] }
 0x130   :  { %v347_v21 = vadd.f32 %v299_v47, %v3801_v27  ;;  %v348_v22 = vadd.f32 %v300_v48, %v3803_v28  ;;  %v491_v23 = vsel %vm490_vm1, %v489_v63, %v488_v19  ;;  %v349_v24 = vadd.f32 %v301_v50, %v3809_v33  ;;  %v3877_v19 = vld [vmem:[#allocation2 + $0x1c] sm:$0x3] }
 0x131   :  { %v350_v25 = vadd.f32 %v302_v51, %v3811_v34  ;;  %v351_v29 = vadd.f32 %v303_v52, %v3813_v35  ;;  %v494_v30 = vsel %vm493_vm2, %v492_v2, %v491_v23  ;;  %v352_v31 = vadd.f32 %v304_v53, %v3815_v40  ;;  %v3854_v52 = vld [vmem:[#allocation2 + $0x10] sm:$0x3]  ;;  %v3873_v2 = vld [vmem:[#allocation2 + $0x18] sm:$0x3]  ;;  %v3879_v23 = vld [vmem:[#allocation2 + $0x1e] sm:$0x3] }
 0x132   :  { %v353_v32 = vadd.f32 %v305_v13, %v3823_v49  ;;  %v370_v36 = vmul.f32 0.5, %v346_v20  ;;  %v497_v37 = vsel %vm496_vm3, %v495_v14, %v494_v30  ;;  %v371_v38 = vmul.f32 0.5, %v347_v21  ;;  %v3875_v13 = vld [vmem:[#allocation2 + $0x1a] sm:$0x3] }
 0x133   :  { %v372_v39 = vmul.f32 0.5, %v348_v22  ;;  %v373_v41 = vmul.f32 0.5, %v349_v24  ;;  %v500_v42 = vsel %vm499_vm4, %v498_v15, %v497_v37  ;;  %v374_v43 = vmul.f32 0.5, %v350_v25 }
 0x134   :  { %v375_v44 = vmul.f32 0.5, %v351_v29  ;;  %v376_v46 = vmul.f32 0.5, %v352_v31  ;;  %v503_v47 = vsel %vm502_vm5, %v501_v16, %v500_v42  ;;  %v377_v48 = vmul.f32 0.5, %v353_v32 }
 0x135   :  { %v398_v50 = vadd.f32 %v3818_v45, %v370_v36  ;;  %v399_v51 = vadd.f32 %v3818_v45, %v371_v38  ;;  %v3857_v53 = vsel %vm505_vm6, %v504_v18, %v503_v47  ;;  %v400_v54 = vadd.f32 %v3818_v45, %v372_v39 }
 0x136   :  { %v401_v55 = vadd.f32 %v3818_v45, %v373_v41  ;;  %v402_v56 = vadd.f32 %v3818_v45, %v374_v43  ;;  %v677_v60 = vsel %vm676_vm7, %v3857_v53, 0.0  ;;  %v403_v61 = vadd.f32 %v3818_v45, %v375_v44 }
 0x137   :  { %v404_v62 = vadd.f32 %v3818_v45, %v376_v46  ;;  %v405_v63 = vadd.f32 %v3818_v45, %v377_v48  ;;  %678 = vadd.xlane.f32.xlu0 %v677_v60  ;;  %v521_v14 = vrot.slane %v399_v51, 7  ;;  %v523_v15 = vrot.slane %v400_v54, 6 }
 0x138   :  { %v525_v16 = vrot.slane %v401_v55, 5  ;;  %v527_v18 = vrot.slane %v402_v56, 4  ;;  %v529_v20 = vrot.slane %v403_v61, 3  ;;  %v290_v24 = vrot.slane %v3854_v52, 1 }
 0x139   :  { %v531_v21 = vrot.slane %v404_v62, 2  ;;  %v533_v22 = vrot.slane %v405_v63, 1  ;;  %v522_v25 = vsel %vm487_vm0, %v521_v14, %v398_v50  ;;  %v291_v29 = vrot.slane %v3862_v57, 1 }
 0x13a   :  { %v292_v30 = vrot.slane %v3864_v58, 1  ;;  %v293_v31 = vrot.slane %v3866_v59, 1  ;;  %v524_v32 = vsel %vm490_vm1, %v523_v15, %v522_v25  ;;  %v294_v36 = vrot.slane %v3873_v2, 1 }
 0x13b   :  { %v295_v37 = vrot.slane %v3875_v13, 1  ;;  %v296_v38 = vrot.slane %v3877_v19, 1  ;;  %v526_v39 = vsel %vm493_vm2, %v525_v16, %v524_v32  ;;  %v297_v41 = vrot.slane %v3879_v23, 1 }
 0x13c   :  { %v338_v42 = vadd.f32 %v290_v24, %v3854_v52  ;;  %v339_v43 = vadd.f32 %v291_v29, %v3862_v57  ;;  %v528_v44 = vsel %vm496_vm3, %v527_v18, %v526_v39  ;;  %v340_v46 = vadd.f32 %v292_v30, %v3864_v58 }
 0x13d   :  { %v341_v47 = vadd.f32 %v293_v31, %v3866_v59  ;;  %v342_v48 = vadd.f32 %v294_v36, %v3873_v2  ;;  %v530_v50 = vsel %vm499_vm4, %v529_v20, %v528_v44  ;;  %v343_v51 = vadd.f32 %v295_v37, %v3875_v13 }
 0x13e   :  { %v344_v54 = vadd.f32 %v296_v38, %v3877_v19  ;;  %v345_v55 = vadd.f32 %v297_v41, %v3879_v23  ;;  %v532_v56 = vsel %vm502_vm5, %v531_v21, %v530_v50  ;;  %v362_v60 = vmul.f32 0.5, %v338_v42 }
 0x13f   :  { %v363_v61 = vmul.f32 0.5, %v339_v43  ;;  %v364_v62 = vmul.f32 0.5, %v340_v46  ;;  %v3904_v63 = vsel %vm505_vm6, %v533_v22, %v532_v56  ;;  %v365_v14 = vmul.f32 0.5, %v341_v47 }
 0x140   :  { %v366_v15 = vmul.f32 0.5, %v342_v48  ;;  %v367_v16 = vmul.f32 0.5, %v343_v51  ;;  %v683_v18 = vsel %vm676_vm7, %v3904_v63, 0.0  ;;  %v368_v20 = vmul.f32 0.5, %v344_v54 }
 0x141   :  { %v369_v24 = vmul.f32 0.5, %v345_v55  ;;  %v390_v25 = vadd.f32 %v3818_v45, %v362_v60  ;;  %684 = vadd.xlane.f32.xlu1 %v683_v18  ;;  %v391_v29 = vadd.f32 %v3818_v45, %v363_v61  ;;  %v392_v21 = vadd.f32 %v3818_v45, %v364_v62 }
 0x142   :  { %v393_v30 = vadd.f32 %v3818_v45, %v365_v14  ;;  %v394_v22 = vadd.f32 %v3818_v45, %v366_v15  ;;  %v395_v31 = vadd.f32 %v3818_v45, %v367_v16  ;;  %v396_v32 = vadd.f32 %v3818_v45, %v368_v20 }
 0x143   :  { %v397_v36 = vadd.f32 %v3818_v45, %v369_v24  ;;  %v3919_v37 = vrot.slane %v3789_v17, %v408_v11  ;;  %v507_v38 = vrot.slane %v391_v29, 7  ;;  %v509_v39 = vrot.slane %v392_v21, 6 }
 0x144   :  { %v511_v41 = vrot.slane %v393_v30, 5  ;;  %v513_v42 = vrot.slane %v394_v22, 4  ;;  %v515_v43 = vrot.slane %v395_v31, 3  ;;  %v517_v44 = vrot.slane %v396_v32, 2 }
 0x145   :  { %v519_v46 = vrot.slane %v397_v36, 1  ;;  %v410_v47 = vadd.f32 %v3919_v37, %v3767_v3  ;;  %v508_v48 = vsel %vm487_vm0, %v507_v38, %v390_v25  ;;  %v411_v45 = vadd.f32 %v3919_v37, %v3769_v4 }
 0x146   :  { %v412_v50 = vadd.f32 %v3919_v37, %v3771_v5  ;;  %v413_v11 = vadd.f32 %v3919_v37, %v3773_v6  ;;  %v510_v51 = vsel %vm490_vm1, %v509_v39, %v508_v48  ;;  %v414_v54 = vadd.f32 %v3919_v37, %v3775_v7 }
 0x147   :  { %v415_v55 = vadd.f32 %v3919_v37, %v3777_v8  ;;  %v416_v56 = vadd.f32 %v3919_v37, %v3779_v9  ;;  %v512_v60 = vsel %vm493_vm2, %v511_v41, %v510_v51  ;;  %v417_v61 = vadd.f32 %v3919_v37, %v3781_v10 }
 0x148   :  { %v562_v62 = vrot.slane %v411_v45, 7  ;;  %v564_v14 = vrot.slane %v412_v50, 6  ;;  %v514_v15 = vsel %vm496_vm3, %v513_v42, %v512_v60  ;;  %v566_v16 = vrot.slane %v413_v11, 5 }
 0x149   :  { %v568_v18 = vrot.slane %v414_v54, 4  ;;  %v570_v20 = vrot.slane %v415_v55, 3  ;;  %v516_v24 = vsel %vm499_vm4, %v515_v43, %v514_v15  ;;  %v572_v29 = vrot.slane %v416_v56, 2 }
 0x14a   :  { %v563_v25 = vsel %vm487_vm0, %v562_v62, %v410_v47  ;;  %v574_v21 = vrot.slane %v417_v61, 1  ;;  %v518_v30 = vsel %vm502_vm5, %v517_v44, %v516_v24  ;;  %v418_v31 = vadd.f32 %v3919_v37, %v3854_v52 }
 0x14b   :  { %v565_v22 = vsel %vm490_vm1, %v564_v14, %v563_v25  ;;  %v419_v32 = vadd.f32 %v3919_v37, %v3862_v57  ;;  %v3950_v36 = vsel %vm505_vm6, %v519_v46, %v518_v30  ;;  %v420_v39 = vadd.f32 %v3919_v37, %v3864_v58 }
 0x14c   :  { %v567_v38 = vsel %vm493_vm2, %v566_v16, %v565_v22  ;;  %v421_v41 = vadd.f32 %v3919_v37, %v3866_v59  ;;  %v680_v42 = vsel %vm676_vm7, %v3950_v36, 0.0  ;;  %v422_v44 = vadd.f32 %v3919_v37, %v3873_v2 }
 0x14d   :  { %v569_v43 = vsel %vm496_vm3, %v568_v18, %v567_v38  ;;  %v423_v46 = vadd.f32 %v3919_v37, %v3875_v13  ;;  %681 = vadd.xlane.f32.xlu0 %v680_v42  ;;  %v424_v48 = vadd.f32 %v3919_v37, %v3877_v19  ;;  %v425_v45 = vadd.f32 %v3919_v37, %v3879_v23 }
 0x14e   :  { %v571_v47 = vsel %vm499_vm4, %v570_v20, %v569_v43  ;;  %v576_v50 = vrot.slane %v419_v32, 7  ;;  %v578_v51 = vrot.slane %v420_v39, 6  ;;  %v580_v54 = vrot.slane %v421_v41, 5 }
 0x14f   :  { %v573_v11 = vsel %vm502_vm5, %v572_v29, %v571_v47  ;;  %v582_v55 = vrot.slane %v422_v44, 4  ;;  %v584_v61 = vrot.slane %v423_v46, 3  ;;  %v586_v62 = vrot.slane %v424_v48, 2 }
 0x150   :  { %v3971_v56 = vsel %vm505_vm6, %v574_v21, %v573_v11  ;;  %v577_v60 = vsel %vm487_vm0, %v576_v50, %v418_v31  ;;  %v588_v16 = vrot.slane %v425_v45, 1  ;;  %v426_v18 = vadd.f32 %v3919_v37, %v3799_v26 }
 0x151   :  { %v686_v14 = vsel %vm676_vm7, %v3971_v56, 0.0  ;;  %v579_v15 = vsel %vm490_vm1, %v578_v51, %v577_v60  ;;  %v427_v24 = vadd.f32 %v3919_v37, %v3801_v27  ;;  %v428_v25 = vadd.f32 %v3919_v37, %v3803_v28 }
 0x152   :  { %687 = vadd.xlane.f32.xlu1 %v686_v14  ;;  %v581_v20 = vsel %vm493_vm2, %v580_v54, %v579_v15  ;;  %v429_v29 = vadd.f32 %v3919_v37, %v3809_v33  ;;  %v430_v30 = vadd.f32 %v3919_v37, %v3811_v34  ;;  %v431_v22 = vadd.f32 %v3919_v37, %v3813_v35 }
 0x153   :  { %v583_v21 = vsel %vm496_vm3, %v582_v55, %v581_v20  ;;  %v432_v31 = vadd.f32 %v3919_v37, %v3815_v40  ;;  %v433_v38 = vadd.f32 %v3919_v37, %v3823_v49  ;;  %v590_v39 = vrot.slane %v427_v24, 7 }
 0x154   :  { %v585_v32 = vsel %vm499_vm4, %v584_v61, %v583_v21  ;;  %v592_v41 = vrot.slane %v428_v25, 6  ;;  %v594_v43 = vrot.slane %v429_v29, 5  ;;  %v596_v44 = vrot.slane %v430_v30, 4 }
 0x155   :  { %v587_v42 = vsel %vm502_vm5, %v586_v62, %v585_v32  ;;  %v591_v47 = vsel %vm487_vm0, %v590_v39, %v426_v18  ;;  %v598_v48 = vrot.slane %v431_v22, 3  ;;  %v600_v11 = vrot.slane %v432_v31, 2 }
 0x156   :  { %v3998_v46 = vsel %vm505_vm6, %v588_v16, %v587_v42  ;;  %v593_v50 = vsel %vm490_vm1, %v592_v41, %v591_v47  ;;  %v437_v37 = vrot.slane %v3789_v17, %v436_v12  ;;  %v602_v54 = vrot.slane %v433_v38, 1 }
 0x157   :  { %v689_v45 = vsel %vm676_vm7, %v3998_v46, 0.0  ;;  %v595_v51 = vsel %vm493_vm2, %v594_v43, %v593_v50  ;;  %vm3481_vm8 = vmmov 0   ;;  %vm1806_vm9 = vcmask 1043456  }
 0x158   :  { %690 = vadd.xlane.f32.xlu0 %v689_v45  ;;  %v597_v55 = vsel %vm496_vm3, %v596_v44, %v595_v51  ;;  %v438_v60 = vadd.f32 %v437_v37, %v3767_v3  ;;  %v439_v61 = vadd.f32 %v437_v37, %v3769_v4  ;;  %v440_v62 = vadd.f32 %v437_v37, %v3771_v5 }
 0x159   :  { %v599_v14 = vsel %vm499_vm4, %v598_v48, %v597_v55  ;;  %v441_v15 = vadd.f32 %v437_v37, %v3773_v6  ;;  %v442_v1 = vadd.f32 %v437_v37, %v3775_v7  ;;  %v443_v12 = vadd.f32 %v437_v37, %v3777_v8 }
 0x15a   :  { %v601_v17 = vsel %vm502_vm5, %v600_v11, %v599_v14  ;;  %v444_v16 = vadd.f32 %v437_v37, %v3779_v9  ;;  %v445_v18 = vadd.f32 %v437_v37, %v3781_v10  ;;  %v631_v20 = vrot.slane %v438_v60, 1 }
 0x15b   :  { %v4020_v3 = vsel %vm505_vm6, %v602_v54, %v601_v17  ;;  %v633_v4 = vrot.slane %v440_v62, 7  ;;  %v635_v5 = vrot.slane %v441_v15, 6  ;;  %v637_v24 = vrot.slane %v442_v1, 5 }
 0x15c   :  { %v692_v6 = vsel %vm676_vm7, %v4020_v3, 0.0  ;;  %v632_v7 = vsel %vm487_vm0, %v439_v61, %v631_v20  ;;  %v639_v25 = vrot.slane %v443_v12, 4  ;;  %v641_v8 = vrot.slane %v444_v16, 3 }
 0x15d   :  { %693 = vadd.xlane.f32.xlu1 %v692_v6  ;;  %v634_v29 = vsel %vm490_vm1, %v633_v4, %v632_v7  ;;  %v643_v9 = vrot.slane %v445_v18, 2  ;;  %v446_v10 = vadd.f32 %v437_v37, %v3854_v52  ;;  %v447_v21 = vadd.f32 %v437_v37, %v3862_v57 }
 0x15e   :  { %v636_v30 = vsel %vm493_vm2, %v635_v5, %v634_v29  ;;  %v448_v22 = vadd.f32 %v437_v37, %v3864_v58  ;;  %v449_v31 = vadd.f32 %v437_v37, %v3866_v59  ;;  %v450_v32 = vadd.f32 %v437_v37, %v3873_v2 }
 0x15f   :  { %v638_v38 = vsel %vm496_vm3, %v637_v24, %v636_v30  ;;  %v451_v39 = vadd.f32 %v437_v37, %v3875_v13  ;;  %v452_v41 = vadd.f32 %v437_v37, %v3877_v19  ;;  %v453_v42 = vadd.f32 %v437_v37, %v3879_v23 }
 0x160   :  { %v640_v52 = vsel %vm499_vm4, %v639_v25, %v638_v38  ;;  %v645_v43 = vrot.slane %v446_v10, 1  ;;  %v647_v57 = vrot.slane %v448_v22, 7  ;;  %v649_v44 = vrot.slane %v449_v31, 6 }
 0x161   :  { %v642_v47 = vsel %vm502_vm5, %v641_v8, %v640_v52  ;;  %v651_v58 = vrot.slane %v450_v32, 5  ;;  %v653_v48 = vrot.slane %v451_v39, 4  ;;  %v655_v59 = vrot.slane %v452_v41, 3 }
 0x162   :  { %v4039_v2 = vsel %vm505_vm6, %v643_v9, %v642_v47  ;;  %v646_v45 = vsel %vm487_vm0, %v447_v21, %v645_v43  ;;  %v657_v13 = vrot.slane %v453_v42, 2  ;;  %v454_v19 = vadd.f32 %v437_v37, %v3799_v26 }
 0x163   :  { %v695_v23 = vsel %vm676_vm7, %v4039_v2, 0.0  ;;  %v648_v50 = vsel %vm490_vm1, %v647_v57, %v646_v45  ;;  %v455_v11 = vadd.f32 %v437_v37, %v3801_v27  ;;  %v456_v51 = vadd.f32 %v437_v37, %v3803_v28 }
 0x164   :  { %696 = vadd.xlane.f32.xlu0 %v695_v23  ;;  %v650_v54 = vsel %vm493_vm2, %v649_v44, %v648_v50  ;;  %v457_v55 = vadd.f32 %v437_v37, %v3809_v33  ;;  %v458_v60 = vadd.f32 %v437_v37, %v3811_v34  ;;  %v459_v61 = vadd.f32 %v437_v37, %v3813_v35 }
 0x165   :  { %v652_v26 = vsel %vm496_vm3, %v651_v58, %v650_v54  ;;  %v460_v62 = vadd.f32 %v437_v37, %v3815_v40  ;;  %v461_v14 = vadd.f32 %v437_v37, %v3823_v49  ;;  %v659_v15 = vrot.slane %v454_v19, 1 }
 0x166   :  { %v654_v27 = vsel %vm499_vm4, %v653_v48, %v652_v26  ;;  %v661_v1 = vrot.slane %v456_v51, 7  ;;  %v663_v28 = vrot.slane %v457_v55, 6  ;;  %v665_v12 = vrot.slane %v458_v60, 5 }
 0x167   :  { %v656_v17 = vsel %vm502_vm5, %v655_v59, %v654_v27  ;;  %v660_v33 = vsel %vm487_vm0, %v455_v11, %v659_v15  ;;  %v667_v16 = vrot.slane %v459_v61, 4  ;;  %v669_v18 = vrot.slane %v460_v62, 3  ;;  %v827_v27 = vld [vmem:[%s4671_s4] sm:$0xff] }
 0x168   :  { %v658_v34 = vsel %vm505_vm6, %v657_v13, %v656_v17  ;;  %v662_v35 = vsel %vm490_vm1, %v661_v1, %v660_v33  ;;  %v671_v37 = vrot.slane %v461_v14, 2  ;;  %v828_v1 = vld [vmem:[%s4671_s4 + $0x8] sm:$0xff]  ;;  %v829_v17 = vld [vmem:[%s4671_s4 + $0x10] sm:$0xff]  ;;  %v830_v33 = vld [vmem:[%s4671_s4 + $0x18] sm:$0xff]  ;;  %vm1796_vm10 = vcmask 31744   ;;  %s3422_s4 = scalar_lea.vmem %s2247_s22, 384 }
 0x169   :  { %v698_v40 = vsel %vm676_vm7, %v658_v34, 0.0  ;;  %v664_v49 = vsel %vm493_vm2, %v663_v28, %v662_v35  ;;  %v3480_v28 = vmov 0.0|0.0   ;;  %p3423_p0 = scmp.ne.s32.totalorder %s2247_s22, %s3422_s4  ;;  %p3428_p2 = scmp.lt.s32.totalorder %s3422_s4, %s3422_s4 }
 0x16a   :  { %699 = vadd.xlane.f32.xlu1 %v698_v40  ;;  %v666_v20 = vsel %vm496_vm3, %v665_v12, %v664_v49  ;;  %2856 = vmatprep.subr.bf16.mxu1 %v3480_v28  ;;  %v2857_v12 = vpack.c.bf16 %v828_v1, %v827_v27 }
 0x16b   :  { %v668_v4 = vsel %vm499_vm4, %v667_v16, %v666_v20  ;;  %2886 = vmatprep.subr.bf16.mxu0 %v3480_v28  ;;  %v2860_v16 = vpack.c.bf16 %v830_v33, %v829_v17  ;;  %v4139_v20 = vld [vmem:[#allocation7] ss:$0 sm:$0xff]  ;;  %p3429_p3 = por %p3428_p2, %p3427_p1 }
 0x16c   :  { %v670_v5 = vsel %vm502_vm5, %v669_v18, %v668_v4  ;;  %2858 = vmatpush3.bf16.msra.mxu1 %v2857_v12 }
 0x16d   :  { %v672_v24 = vsel %vm505_vm6, %v671_v37, %v670_v5  ;;  %2859 = vmatprep.subr.bf16.mxu1 %v3480_v28  ;;  %p3430_p4 = pnand %p3429_p3, %p3423_p0 }
 0x16e   :  { %v701_v6 = vsel %vm676_vm7, %v672_v24, 0.0 }
 0x16f   :  { %702 = vadd.xlane.f32.xlu0 %v701_v6 }
 0x170   :  { %2861 = vmatpush3.bf16.msra.mxu1 %v2860_v16 }
 0x171   :  { %2862 = vmatprep.subr.bf16.mxu1 %v3480_v28 }
 0x1c4   :  { %v679_v7 = vpop.xlane.xlu0 %678 }
 0x1c5   :  { %v705_v25 = vmul.f32 0.03125, %v679_v7 }
 0x1c7   :  { %v4068_v8 = vsub.f32 %v3857_v53, %v705_v25 }
 0x1c9   :  { %v723_v29 = vmul.f32 %v4068_v8, %v4068_v8 }
 0x1cb   :  { %v732_v9 = vsel %vm676_vm7, %v723_v29, 0.0 }
 0x1cc   :  { %733 = vadd.xlane.f32.xlu1 %v732_v9 }
 0x1ce   :  { %v685_v10 = vpop.xlane.xlu1 %684 }
 0x1cf   :  { %v707_v21 = vmul.f32 0.03125, %v685_v10 }
 0x1d1   :  { %v4074_v30 = vsub.f32 %v3904_v63, %v707_v21 }
 0x1d3   :  { %v725_v22 = vmul.f32 %v4074_v30, %v4074_v30 }
 0x1d5   :  { %v738_v31 = vsel %vm676_vm7, %v725_v22, 0.0 }
 0x1d6   :  { %739 = vadd.xlane.f32.xlu1 %v738_v31 }
 0x1da   :  { %v682_v32 = vpop.xlane.xlu0 %681 }
 0x1db   :  { %v706_v53 = vmul.f32 0.03125, %v682_v32 }
 0x1dd   :  { %v4080_v38 = vsub.f32 %v3950_v36, %v706_v53 }
 0x1df   :  { %v688_v39 = vpop.xlane.xlu1 %687  ;;  %v724_v42 = vmul.f32 %v4080_v38, %v4080_v38 }
 0x1e0   :  { %v708_v41 = vmul.f32 0.03125, %v688_v39 }
 0x1e1   :  { %v735_v63 = vsel %vm676_vm7, %v724_v42, 0.0 }
 0x1e2   :  { %v4085_v52 = vsub.f32 %v3971_v56, %v708_v41  ;;  %736 = vadd.xlane.f32.xlu0 %v735_v63 }
 0x1e4   :  { %v726_v43 = vmul.f32 %v4085_v52, %v4085_v52 }
 0x1e5   :  { %v691_v57 = vpop.xlane.xlu0 %690 }
 0x1e6   :  { %v709_v44 = vmul.f32 0.03125, %v691_v57  ;;  %v741_v47 = vsel %vm676_vm7, %v726_v43, 0.0 }
 0x1e7   :  { %742 = vadd.xlane.f32.xlu0 %v741_v47 }
 0x1e8   :  { %v4092_v36 = vsub.f32 %v3998_v46, %v709_v44 }
 0x1ea   :  { %v727_v58 = vmul.f32 %v4092_v36, %v4092_v36  ;;  %v694_v48 = vpop.xlane.xlu1 %693 }
 0x1eb   :  { %v710_v56 = vmul.f32 0.03125, %v694_v48 }
 0x1ec   :  { %v744_v59 = vsel %vm676_vm7, %v727_v58, 0.0 }
 0x1ed   :  { %745 = vadd.xlane.f32.xlu1 %v744_v59  ;;  %v4098_v45 = vsub.f32 %v4020_v3, %v710_v56 }
 0x1ef   :  { %v728_v13 = vmul.f32 %v4098_v45, %v4098_v45 }
 0x1f1   :  { %v697_v19 = vpop.xlane.xlu0 %696  ;;  %v747_v23 = vsel %vm676_vm7, %v728_v13, 0.0 }
 0x1f2   :  { %v711_v50 = vmul.f32 0.03125, %v697_v19  ;;  %748 = vadd.xlane.f32.xlu0 %v747_v23 }
 0x1f4   :  { %v4104_v46 = vsub.f32 %v4039_v2, %v711_v50 }
 0x1f6   :  { %v729_v11 = vmul.f32 %v4104_v46, %v4104_v46 }
 0x1f7   :  { %v700_v51 = vpop.xlane.xlu1 %699 }
 0x1f8   :  { %v712_v54 = vmul.f32 0.03125, %v700_v51  ;;  %v750_v55 = vsel %vm676_vm7, %v729_v11, 0.0 }
 0x1f9   :  { %751 = vadd.xlane.f32.xlu1 %v750_v55 }
 0x1fa   :  { %v4109_v3 = vsub.f32 %v658_v34, %v712_v54  ;;  %v3482_v34 = vmov 0.0  }
 0x1fb   :  { %2473 = vmatprep.mubr.msk.f32.mxu1 %vm3481_vm8, %v3482_v34  ;;  %2573 = vmatprep.mubr.msk.f32.mxu0 %vm3481_vm8, %v3482_v34 }
 0x1fc   :  { %v703_v60 = vpop.xlane.xlu0 %702  ;;  %v730_v61 = vmul.f32 %v4109_v3, %v4109_v3 }
 0x1fd   :  { %v713_v26 = vmul.f32 0.03125, %v703_v60 }
 0x1fe   :  { %v753_v62 = vsel %vm676_vm7, %v730_v61, 0.0 }
 0x1ff   :  { %v4114_v14 = vsub.f32 %v672_v24, %v713_v26  ;;  %754 = vadd.xlane.f32.xlu0 %v753_v62  ;;  %v4142_v24 = vld [vmem:[#allocation8] ss:$0 sm:$0xff] }
 0x201   :  { %v731_v2 = vmul.f32 %v4114_v14, %v4114_v14 }
 0x203   :  { %v756_v15 = vsel %vm676_vm7, %v731_v2, 0.0 }
 0x204   :  { %757 = vadd.xlane.f32.xlu1 %v756_v15 }
 0x259   :  { %v734_v35 = vpop.xlane.xlu1 %733 }
 0x25a   :  { %v759_v18 = vmul.f32 0.03125, %v734_v35 }
 0x25c   :  { %v768_v40 = vadd.f32 1e-05, %v759_v18 }
 0x25e   :  { %3054 = vrsqrt.f32 %v768_v40 }
 0x263   :  { %v740_v49 = vpop.xlane.xlu1 %739 }
 0x264   :  { %v761_v5 = vmul.f32 0.03125, %v740_v49 }
 0x266   :  { %v770_v25 = vadd.f32 1e-05, %v761_v5 }
 0x268   :  { %v3055_v37 = vpop.eup %3054  ;;  %3056 = vrsqrt.f32 %v770_v25 }
 0x269   :  { %v786_v4 = vmul.f32 %v3055_v37, %v4068_v8 }
 0x26b   :  { %v802_v6 = vmul.f32 %v4139_v20, %v786_v4 }
 0x26d   :  { %v818_v7 = vadd.f32 %v4142_v24, %v802_v6 }
 0x26f   :  { %v737_v29 = vpop.xlane.xlu0 %736  ;;  %2474 = vmatmul.mubr.msk.f32.vlgmr.msra.gmra.mrb[0].mxu1 %vm676_vm7, %v818_v7 }
 0x270   :  { %v760_v9 = vmul.f32 0.03125, %v737_v29  ;;  %2476 = vmatprep.mubr.msk.f32.mxu1 %vm3481_vm8, %v3482_v34 }
 0x272   :  { %v769_v10 = vadd.f32 1e-05, %v760_v9  ;;  %v3057_v53 = vpop.eup %3056 }
 0x273   :  { %v788_v43 = vmul.f32 %v3057_v53, %v4074_v30 }
 0x274   :  { %v743_v21 = vpop.xlane.xlu0 %742  ;;  %3058 = vrsqrt.f32 %v769_v10 }
 0x275   :  { %v762_v8 = vmul.f32 0.03125, %v743_v21  ;;  %v804_v56 = vmul.f32 %v4139_v20, %v788_v43 }
 0x277   :  { %v771_v22 = vadd.f32 1e-05, %v762_v8  ;;  %v820_v30 = vadd.f32 %v4142_v24, %v804_v56 }
 0x279   :  { %3060 = vrsqrt.f32 %v771_v22 }
 0x27a   :  { %v746_v31 = vpop.xlane.xlu1 %745 }
 0x27b   :  { %v763_v32 = vmul.f32 0.03125, %v746_v31 }
 0x27d   :  { %v772_v39 = vadd.f32 1e-05, %v763_v32 }
 0x27e   :  { %v3059_v41 = vpop.eup %3058 }
 0x27f   :  { %3062 = vrsqrt.f32 %v772_v39  ;;  %v749_v42 = vpop.xlane.xlu0 %748  ;;  %v787_v63 = vmul.f32 %v3059_v41, %v4080_v38 }
 0x280   :  { %v764_v57 = vmul.f32 0.03125, %v749_v42 }
 0x281   :  { %v803_v44 = vmul.f32 %v4139_v20, %v787_v63 }
 0x282   :  { %v773_v58 = vadd.f32 1e-05, %v764_v57 }
 0x283   :  { %v3061_v47 = vpop.eup %3060  ;;  %v819_v48 = vadd.f32 %v4142_v24, %v803_v44 }
 0x284   :  { %v789_v59 = vmul.f32 %v3061_v47, %v4085_v52  ;;  %3064 = vrsqrt.f32 %v773_v58 }
 0x285   :  { %2477 = vmatmul.mubr.msk.f32.gmra.mrb[2].mxu1 %vm676_vm7, %v819_v48 }
 0x286   :  { %v752_v13 = vpop.xlane.xlu1 %751  ;;  %2479 = vmatprep.mubr.msk.f32.mxu1 %vm3481_vm8, %v3482_v34  ;;  %v805_v19 = vmul.f32 %v4139_v20, %v789_v59  ;;  %v1107_v59 = vld [vmem:[%s4675_s8] sm:$0xff] }
 0x287   :  { %v765_v38 = vmul.f32 0.03125, %v752_v13  ;;  %v1108_v13 = vld [vmem:[%s4675_s8 + $0x8] sm:$0xff] }
 0x288   :  { %v821_v52 = vadd.f32 %v4142_v24, %v805_v19  ;;  %v1110_v19 = vld [vmem:[%s4675_s8 + $0x18] sm:$0xff] }
 0x289   :  { %v3063_v23 = vpop.eup %3062  ;;  %v774_v50 = vadd.f32 1e-05, %v765_v38  ;;  %2480 = vmatmul.mubr.msk.f32.gmra.mrb[4].mxu1 %vm676_vm7, %v820_v30  ;;  %v1109_v38 = vld [vmem:[%s4675_s8 + $0x10] sm:$0xff]  ;;  %v2863_v30 = vpack.c.bf16 %v1108_v13, %v1107_v59 }
 0x28a   :  { %v790_v11 = vmul.f32 %v3063_v23, %v4092_v36  ;;  %2482 = vmatprep.mubr.msk.f32.mxu1 %vm3481_vm8, %v3482_v34  ;;  %v1210_v23 = vld [vmem:[#allocation16] sm:$0xff]  ;;  %v1117_v13 = vld [vmem:[%s4675_s8 + $0x50] sm:$0xff] }
 0x28b   :  { %3066 = vrsqrt.f32 %v774_v50  ;;  %v1211_v50 = vld [vmem:[#allocation16 + $0x8] sm:$0xff]  ;;  %2864 = vmatpush3.bf16.msra.mxu1 %v2863_v30  ;;  %v1220_v30 = vld [vmem:[#allocation16 + $0x50] sm:$0xff] }
 0x28c   :  { %v806_v51 = vmul.f32 %v4139_v20, %v790_v11  ;;  %v755_v54 = vpop.xlane.xlu0 %754  ;;  %v2887_v11 = vpack.c.bf16 %v1211_v50, %v1210_v23  ;;  %2865 = vmatprep.subr.bf16.mxu1 %v3480_v28  ;;  %v1221_v23 = vld [vmem:[#allocation16 + $0x58] sm:$0xff] }
 0x28d   :  { %v766_v55 = vmul.f32 0.03125, %v755_v54  ;;  %2483 = vmatmul.mubr.msk.f32.gmra.mrb[6].mxu1 %vm676_vm7, %v821_v52  ;;  %v1212_v52 = vld [vmem:[#allocation16 + $0x10] sm:$0xff]  ;;  %v1213_v54 = vld [vmem:[#allocation16 + $0x18] sm:$0xff]  ;;  %v2902_v50 = vpack.c.bf16 %v1221_v23, %v1220_v30 }
 0x28e   :  { %v3065_v60 = vpop.eup %3064  ;;  %2485 = vmatprep.mubr.msk.f32.mxu1 %vm3481_vm8, %v3482_v34  ;;  %v822_v26 = vadd.f32 %v4142_v24, %v806_v51  ;;  %v2866_v51 = vpack.c.bf16 %v1110_v19, %v1109_v38  ;;  %2888 = vmatpush3.bf16.msra.mxu0 %v2887_v11  ;;  %v1118_v38 = vld [vmem:[%s4675_s8 + $0x58] sm:$0xff] }
 0x28f   :  { %v775_v61 = vadd.f32 1e-05, %v766_v55  ;;  %v791_v36 = vmul.f32 %v3065_v60, %v4098_v45  ;;  %v1111_v55 = vld [vmem:[%s4675_s8 + $0x20] sm:$0xff]  ;;  %v1112_v60 = vld [vmem:[%s4675_s8 + $0x28] sm:$0xff]  ;;  %2889 = vmatprep.subr.bf16.mxu0 %v3480_v28 }
 0x290   :  { %2867 = vmatpush3.bf16.msra.mxu1 %v2866_v51  ;;  %v1120_v51 = vld [vmem:[%s4675_s8 + $0x68] sm:$0xff]  ;;  %v1350_v30 = vld [vmem:[#allocation19 + $0x38] sm:$0xff] }
 0x291   :  { %v758_v62 = vpop.xlane.xlu1 %757  ;;  %3068 = vrsqrt.f32 %v775_v61  ;;  %2486 = vmatmul.mubr.msk.f32.gmra.mrb[8].mxu1 %vm676_vm7, %v822_v26  ;;  %v807_v2 = vmul.f32 %v4139_v20, %v791_v36  ;;  %v2890_v61 = vpack.c.bf16 %v1213_v54, %v1212_v52  ;;  %v1214_v26 = vld [vmem:[#allocation16 + $0x20] sm:$0xff]  ;;  %v1215_v36 = vld [vmem:[#allocation16 + $0x28] sm:$0xff]  ;;  %2868 = vmatprep.subr.bf16.mxu1 %v3480_v28 }
 0x292   :  { %v767_v15 = vmul.f32 0.03125, %v758_v62  ;;  %2488 = vmatprep.mubr.msk.f32.mxu1 %vm3481_vm8, %v3482_v34  ;;  %v2869_v62 = vpack.c.bf16 %v1112_v60, %v1111_v55  ;;  %v1119_v52 = vld [vmem:[%s4675_s8 + $0x60] sm:$0xff] }
 0x293   :  { %v823_v27 = vadd.f32 %v4142_v24, %v807_v2  ;;  %2891 = vmatpush3.bf16.msra.mxu0 %v2890_v61  ;;  %v2893_v2 = vpack.c.bf16 %v1215_v36, %v1214_v26  ;;  %v1222_v54 = vld [vmem:[#allocation16 + $0x60] sm:$0xff]  ;;  %v2881_v61 = vpack.c.bf16 %v1120_v51, %v1119_v52  ;;  %v1483_v52 = vld [vmem:[%s4683_s16 + $0x38] sm:$0xff] }
 0x294   :  { %v776_v1 = vadd.f32 1e-05, %v767_v15  ;;  %v1113_v15 = vld [vmem:[%s4675_s8 + $0x30] sm:$0xff]  ;;  %2892 = vmatprep.subr.bf16.mxu0 %v3480_v28  ;;  %2870 = vmatpush3.bf16.msra.mxu1 %v2869_v62 }
 0x295   :  { %v3067_v12 = vpop.eup %3066  ;;  %2489 = vmatmul.mubr.msk.f32.gmra.mrb[10].mxu1 %vm676_vm7, %v823_v27  ;;  %v1114_v27 = vld [vmem:[%s4675_s8 + $0x38] sm:$0xff]  ;;  %2871 = vmatprep.subr.bf16.mxu1 %v3480_v28 }
 0x296   :  { %3070 = vrsqrt.f32 %v776_v1  ;;  %2491 = vmatprep.mubr.msk.f32.mxu1 %vm3481_vm8, %v3482_v34  ;;  %v792_v45 = vmul.f32 %v3067_v12, %v4104_v46  ;;  %v2872_v1 = vpack.c.bf16 %v1114_v27, %v1113_v15  ;;  %v1122_v15 = vld [vmem:[%s4675_s8 + $0x78] sm:$0xff]  ;;  %v1224_v27 = vld [vmem:[#allocation16 + $0x70] sm:$0xff] }
 0x297   :  { %2894 = vmatpush3.bf16.msra.mxu0 %v2893_v2  ;;  %v1121_v2 = vld [vmem:[%s4675_s8 + $0x70] sm:$0xff] }
 0x298   :  { %v808_v17 = vmul.f32 %v4139_v20, %v792_v45  ;;  %2895 = vmatprep.subr.bf16.mxu0 %v3480_v28  ;;  %2873 = vmatpush3.bf16.msra.mxu1 %v2872_v1  ;;  %v2884_v1 = vpack.c.bf16 %v1122_v15, %v1121_v2  ;;  %v1485_v2 = vld [vmem:[%s4683_s16 + $0x48] sm:$0xff] }
 0x299   :  { %2874 = vmatprep.subr.bf16.mxu1 %v3480_v28 }
 0x29a   :  { %v824_v33 = vadd.f32 %v4142_v24, %v808_v17 }
 0x29b   :  { %v3069_v16 = vpop.eup %3068 }
 0x29c   :  { %2492 = vmatmul.mubr.msk.f32.gmra.mrb[12].mxu1 %vm676_vm7, %v824_v33  ;;  %v793_v35 = vmul.f32 %v3069_v16, %v4109_v3  ;;  %v2267_v3 = vld [vmem:[#allocation10] ss:$0 sm:$0xff] }
 0x29d   :  { %2494 = vmatprep.mubr.msk.f32.mxu1 %vm3481_vm8, %v3482_v34 }
 0x29e   :  { %v809_v18 = vmul.f32 %v4139_v20, %v793_v35 }
 0x2a0   :  { %v3071_v40 = vpop.eup %3070  ;;  %v825_v49 = vadd.f32 %v4142_v24, %v809_v18 }
 0x2a1   :  { %v794_v37 = vmul.f32 %v3071_v40, %v4114_v14 }
 0x2a2   :  { %2495 = vmatmul.mubr.msk.f32.gmra.mrb[14].mxu1 %vm676_vm7, %v825_v49 }
 0x2a3   :  { %2497 = vmatprep.mubr.msk.f32.mxu1 %vm3481_vm8, %v3482_v34  ;;  %v810_v46 = vmul.f32 %v4139_v20, %v794_v37 }
 0x2a5   :  { %v826_v4 = vadd.f32 %v4142_v24, %v810_v46 }
 0x2a7   :  { %2498 = vmatmul.mubr.msk.f32.gmra.mrb[16].mxu1 %vm676_vm7, %v826_v4 }
 0x2a8   :  { %2532 = vmatprep.mubr.msk.f32.mxu1 %vm3481_vm8, %v3482_v34 }
 0x342   :  { %v931_v5 = vpop.f32.mrb[0].mxu1 }
 0x343   :  { %v4197_v6 = vadd.f32 %v2267_v3, %v931_v5  ;;  %v2475_v7 = vpop.f32.mrb[1].mxu1 }
 0x345   :  { %975 = vadd.xlane.f32.xlu0 %v4197_v6 }
 0x358   :  { %v936_v14 = vpop.f32.mrb[2].mxu1 }
 0x359   :  { %v4200_v25 = vadd.f32 %v2267_v3, %v936_v14  ;;  %v2478_v29 = vpop.f32.mrb[3].mxu1 }
 0x35a   :  { %v1216_v29 = vld [vmem:[#allocation16 + $0x30] sm:$0xff] }
 0x35b   :  { %977 = vadd.xlane.f32.xlu1 %v4200_v25 }
 0x35c   :  { %v941_v20 = vpop.f32.mrb[4].mxu1 }
 0x35d   :  { %v4203_v24 = vadd.f32 %v2267_v3, %v941_v20  ;;  %v2481_v9 = vpop.f32.mrb[5].mxu1  ;;  %v1217_v20 = vld [vmem:[#allocation16 + $0x38] sm:$0xff] }
 0x35f   :  { %979 = vadd.xlane.f32.xlu0 %v4203_v24 }
 0x360   :  { %v946_v10 = vpop.f32.mrb[6].mxu1 }
 0x361   :  { %v4206_v21 = vadd.f32 %v2267_v3, %v946_v10  ;;  %v2484_v8 = vpop.f32.mrb[7].mxu1  ;;  %v2896_v10 = vpack.c.bf16 %v1217_v20, %v1216_v29 }
 0x363   :  { %981 = vadd.xlane.f32.xlu1 %v4206_v21  ;;  %2897 = vmatpush3.bf16.msra.mxu0 %v2896_v10 }
 0x364   :  { %v951_v22 = vpop.f32.mrb[8].mxu1  ;;  %2898 = vmatprep.subr.bf16.mxu0 %v3480_v28 }
 0x365   :  { %v4209_v31 = vadd.f32 %v2267_v3, %v951_v22  ;;  %v2487_v32 = vpop.f32.mrb[9].mxu1 }
 0x367   :  { %983 = vadd.xlane.f32.xlu0 %v4209_v31 }
 0x368   :  { %v956_v53 = vpop.f32.mrb[10].mxu1 }
 0x369   :  { %v4212_v39 = vadd.f32 %v2267_v3, %v956_v53  ;;  %v2490_v41 = vpop.f32.mrb[11].mxu1 }
 0x36b   :  { %985 = vadd.xlane.f32.xlu1 %v4212_v39 }
 0x36f   :  { %v961_v42 = vpop.f32.mrb[12].mxu1 }
 0x370   :  { %v4215_v63 = vadd.f32 %v2267_v3, %v961_v42  ;;  %v2493_v43 = vpop.f32.mrb[13].mxu1 }
 0x372   :  { %987 = vadd.xlane.f32.xlu0 %v4215_v63 }
 0x375   :  { %v966_v57 = vpop.f32.mrb[14].mxu1 }
 0x376   :  { %v4218_v44 = vadd.f32 %v2267_v3, %v966_v57  ;;  %v2496_v47 = vpop.f32.mrb[15].mxu1  ;;  %v1218_v57 = vld [vmem:[#allocation16 + $0x40] sm:$0xff] }
 0x377   :  { %v1219_v47 = vld [vmem:[#allocation16 + $0x48] sm:$0xff] }
 0x378   :  { %989 = vadd.xlane.f32.xlu1 %v4218_v44 }
 0x37a   :  { %v971_v58 = vpop.f32.mrb[16].mxu1 }
 0x37b   :  { %v4221_v48 = vadd.f32 %v2267_v3, %v971_v58  ;;  %v2499_v56 = vpop.f32.mrb[17].mxu1 }
 0x37c   :  { %v2899_v56 = vpack.c.bf16 %v1219_v47, %v1218_v57 }
 0x37d   :  { %991 = vadd.xlane.f32.xlu0 %v4221_v48 }
 0x37e   :  { %2900 = vmatpush3.bf16.msra.mxu0 %v2899_v56  ;;  %v1480_v56 = vld [vmem:[%s4683_s16 + $0x20] sm:$0xff] }
 0x37f   :  { %2901 = vmatprep.subr.bf16.mxu0 %v3480_v28 }
 0x382   :  { %2903 = vmatpush3.bf16.msra.mxu0 %v2902_v50  ;;  %v1482_v50 = vld [vmem:[%s4683_s16 + $0x30] sm:$0xff] }
 0x383   :  { %2904 = vmatprep.subr.bf16.mxu0 %v3480_v28 }
 0x3d2   :  { %v976_v12 = vpop.xlane.xlu0 %975 }
 0x3d3   :  { %v994_v45 = vmul.f32 0.0078125, %v976_v12  ;;  %v1225_v12 = vld [vmem:[#allocation16 + $0x78] sm:$0xff] }
 0x3d5   :  { %v4256_v17 = vsub.f32 %v4197_v6, %v994_v45  ;;  %v2908_v45 = vpack.c.bf16 %v1225_v12, %v1224_v27  ;;  %v1354_v12 = vld [vmem:[#allocation19 + $0x58] sm:$0xff] }
 0x3d7   :  { %v1012_v33 = vmul.f32 %v4256_v17, %v4256_v17 }
 0x3d9   :  { %1021 = vadd.xlane.f32.xlu1 %v1012_v33 }
 0x3e8   :  { %v978_v16 = vpop.xlane.xlu1 %977 }
 0x3e9   :  { %v995_v35 = vmul.f32 0.0078125, %v978_v16 }
 0x3eb   :  { %v4261_v18 = vsub.f32 %v4200_v25, %v995_v35 }
 0x3ec   :  { %v980_v40 = vpop.xlane.xlu0 %979 }
 0x3ed   :  { %v996_v49 = vmul.f32 0.0078125, %v980_v40  ;;  %v1013_v37 = vmul.f32 %v4261_v18, %v4261_v18 }
 0x3ef   :  { %v4266_v46 = vsub.f32 %v4203_v24, %v996_v49  ;;  %1023 = vadd.xlane.f32.xlu0 %v1013_v37  ;;  %v1115_v24 = vld [vmem:[%s4675_s8 + $0x40] sm:$0xff]  ;;  %v4333_v49 = vld [vmem:[#allocation11] ss:$0 sm:$0xff] }
 0x3f0   :  { %v982_v4 = vpop.xlane.xlu1 %981 }
 0x3f1   :  { %v997_v3 = vmul.f32 0.0078125, %v982_v4  ;;  %v1014_v5 = vmul.f32 %v4266_v46, %v4266_v46  ;;  %v1343_v4 = vld [vmem:[#allocation19] sm:$0xff] }
 0x3f3   :  { %v4271_v6 = vsub.f32 %v4206_v21, %v997_v3  ;;  %1025 = vadd.xlane.f32.xlu1 %v1014_v5  ;;  %v1116_v21 = vld [vmem:[%s4675_s8 + $0x48] sm:$0xff]  ;;  %v4336_v5 = vld [vmem:[#allocation13] ss:$0 sm:$0xff] }
 0x3f4   :  { %v984_v7 = vpop.xlane.xlu0 %983  ;;  %v2875_v22 = vpack.c.bf16 %v1116_v21, %v1115_v24  ;;  %v1344_v3 = vld [vmem:[#allocation19 + $0x8] sm:$0xff]  ;;  %v1345_v24 = vld [vmem:[#allocation19 + $0x10] sm:$0xff] }
 0x3f5   :  { %v998_v14 = vmul.f32 0.0078125, %v984_v7  ;;  %v1015_v25 = vmul.f32 %v4271_v6, %v4271_v6  ;;  %v2911_v29 = vpack.c.bf16 %v1344_v3, %v1343_v4  ;;  %v1486_v4 = vld [vmem:[%s4683_s16 + $0x50] sm:$0xff]  ;;  %v1487_v3 = vld [vmem:[%s4683_s16 + $0x58] sm:$0xff] }
 0x3f6   :  { %2876 = vmatpush3.bf16.msra.mxu1 %v2875_v22  ;;  %v1479_v22 = vld [vmem:[%s4683_s16 + $0x18] sm:$0xff] }
 0x3f7   :  { %v4279_v9 = vsub.f32 %v4209_v31, %v998_v14  ;;  %1027 = vadd.xlane.f32.xlu0 %v1015_v25  ;;  %2877 = vmatprep.subr.bf16.mxu1 %v3480_v28  ;;  %v1476_v14 = vld [vmem:[%s4683_s16] sm:$0xff]  ;;  %v1477_v25 = vld [vmem:[%s4683_s16 + $0x8] sm:$0xff] }
 0x3f8   :  { %v986_v8 = vpop.xlane.xlu1 %985  ;;  %v4348_v10 = vpack.c.bf16 %v1477_v25, %v1476_v14  ;;  %v1355_v14 = vld [vmem:[#allocation19 + $0x60] sm:$0xff] }
 0x3f9   :  { %v999_v32 = vmul.f32 0.0078125, %v986_v8  ;;  %v1016_v53 = vmul.f32 %v4279_v9, %v4279_v9  ;;  %v1478_v8 = vld [vmem:[%s4683_s16 + $0x10] sm:$0xff] }
 0x3fa   :  { %v4364_v57 = vpack.c.bf16 %v1479_v22, %v1478_v8  ;;  %v1488_v22 = vld [vmem:[%s4683_s16 + $0x60] sm:$0xff] }
 0x3fb   :  { %v4288_v41 = vsub.f32 %v4212_v39, %v999_v32  ;;  %1029 = vadd.xlane.f32.xlu1 %v1016_v53 }
 0x3fd   :  { %v1017_v31 = vmul.f32 %v4288_v41, %v4288_v41 }
 0x3ff   :  { %v988_v42 = vpop.xlane.xlu0 %987  ;;  %1031 = vadd.xlane.f32.xlu0 %v1017_v31  ;;  %v1347_v31 = vld [vmem:[#allocation19 + $0x20] sm:$0xff] }
 0x400   :  { %v1000_v43 = vmul.f32 0.0078125, %v988_v42  ;;  %v1348_v42 = vld [vmem:[#allocation19 + $0x28] sm:$0xff] }
 0x402   :  { %v4294_v58 = vsub.f32 %v4215_v63, %v1000_v43  ;;  %v2878_v63 = vpack.c.bf16 %v1118_v38, %v1117_v13  ;;  %v2917_v13 = vpack.c.bf16 %v1348_v42, %v1347_v31  ;;  %v1349_v38 = vld [vmem:[#allocation19 + $0x30] sm:$0xff]  ;;  %v1358_v31 = vld [vmem:[#allocation19 + $0x78] sm:$0xff] }
 0x404   :  { %v1018_v59 = vmul.f32 %v4294_v58, %v4294_v58  ;;  %2879 = vmatpush3.bf16.msra.mxu1 %v2878_v63 }
 0x405   :  { %v990_v39 = vpop.xlane.xlu1 %989  ;;  %2880 = vmatprep.subr.bf16.mxu1 %v3480_v28 }
 0x406   :  { %v1001_v19 = vmul.f32 0.0078125, %v990_v39  ;;  %1033 = vadd.xlane.f32.xlu1 %v1018_v59  ;;  %v1481_v59 = vld [vmem:[%s4683_s16 + $0x28] sm:$0xff] }
 0x407   :  { %v4375_v63 = vpack.c.bf16 %v1481_v59, %v1480_v56 }
 0x408   :  { %v4306_v11 = vsub.f32 %v4218_v44, %v1001_v19  ;;  %v1223_v44 = vld [vmem:[#allocation16 + $0x68] sm:$0xff]  ;;  %2882 = vmatpush3.bf16.msra.mxu1 %v2881_v61 }
 0x409   :  { %v2905_v36 = vpack.c.bf16 %v1223_v44, %v1222_v54  ;;  %2883 = vmatprep.subr.bf16.mxu1 %v3480_v28  ;;  %v2920_v54 = vpack.c.bf16 %v1350_v30, %v1349_v38  ;;  %v4386_v44 = vpack.c.bf16 %v1483_v52, %v1482_v50 }
 0x40a   :  { %v992_v55 = vpop.xlane.xlu0 %991  ;;  %v1019_v60 = vmul.f32 %v4306_v11, %v4306_v11 }
 0x40b   :  { %v1002_v26 = vmul.f32 0.0078125, %v992_v55  ;;  %2906 = vmatpush3.bf16.msra.mxu0 %v2905_v36  ;;  %v1351_v55 = vld [vmem:[#allocation19 + $0x40] sm:$0xff] }
 0x40c   :  { %1035 = vadd.xlane.f32.xlu0 %v1019_v60  ;;  %2907 = vmatprep.subr.bf16.mxu0 %v3480_v28  ;;  %v1352_v60 = vld [vmem:[#allocation19 + $0x48] sm:$0xff]  ;;  %v1484_v36 = vld [vmem:[%s4683_s16 + $0x40] sm:$0xff] }
 0x40d   :  { %v4319_v62 = vsub.f32 %v4221_v48, %v1002_v26  ;;  %2885 = vmatpush3.bf16.msra.mxu1 %v2884_v1  ;;  %v2923_v27 = vpack.c.bf16 %v1352_v60, %v1351_v55  ;;  %v1353_v1 = vld [vmem:[#allocation19 + $0x50] sm:$0xff] }
 0x40e   :  { %2910 = vmatprep.subr.bf16.mxu1 %v3480_v28 }
 0x40f   :  { %v1020_v48 = vmul.f32 %v4319_v62, %v4319_v62  ;;  %2909 = vmatpush3.bf16.msra.mxu0 %v2908_v45 }
 0x410   :  { %2934 = vmatprep.subr.bf16.mxu0 %v3480_v28 }
 0x411   :  { %1037 = vadd.xlane.f32.xlu1 %v1020_v48 }
 0x466   :  { %v1022_v33 = vpop.xlane.xlu1 %1021 }
 0x467   :  { %v1039_v16 = vmul.f32 0.0078125, %v1022_v33  ;;  %v4397_v33 = vpack.c.bf16 %v1485_v2, %v1484_v36 }
 0x469   :  { %v1048_v35 = vadd.f32 1e-05, %v1039_v16 }
 0x46b   :  { %3072 = vrsqrt.f32 %v1048_v35 }
 0x475   :  { %v3073_v40 = vpop.eup %3072 }
 0x476   :  { %v1066_v37 = vmul.f32 %v3073_v40, %v4256_v17  ;;  %v1346_v17 = vld [vmem:[#allocation19 + $0x18] sm:$0xff] }
 0x477   :  { %v2914_v53 = vpack.c.bf16 %v1346_v17, %v1345_v24 }
 0x478   :  { %v1082_v7 = vmul.f32 %v4333_v49, %v1066_v37  ;;  %v2926_v37 = vpack.c.bf16 %v1354_v12, %v1353_v1 }
 0x47a   :  { %v4346_v20 = vadd.f32 %v4336_v5, %v1082_v7 }
 0x47c   :  { %v1024_v21 = vpop.xlane.xlu0 %1023  ;;  %2533 = vmatmul.mubr.f32.vlgmr.msra.gmra.mrb[18].mxu1 %v4346_v20  ;;  %2574 = vmatmul.mubr.f32.vlgmr.msra.gmra.mrb[0].mxu0 %v4346_v20 }
 0x47d   :  { %v1040_v32 = vmul.f32 0.0078125, %v1024_v21  ;;  %2912 = vmatpush3.bf16.msra.mxu1 %v2911_v29  ;;  %2535 = vmatprep.mubr.msk.f32.mxu1 %vm3481_vm8, %v3482_v34  ;;  %v4413_v21 = vpack.c.bf16 %v1487_v3, %v1486_v4  ;;  %v4511_v4 = vld [vmem:[#allocation17] ss:$0 sm:$0xff] }
 0x47e   :  { %2576 = vmatprep.mubr.msk.f32.mxu0 %vm3481_vm8, %v3482_v34  ;;  %2913 = vmatprep.subr.bf16.mxu1 %v3480_v28 }
 0x47f   :  { %v1049_v43 = vadd.f32 1e-05, %v1040_v32  ;;  %2936 = vmatpush3.bf16.msra.mxu0 %v4348_v10  ;;  %v1489_v32 = vld [vmem:[%s4683_s16 + $0x68] sm:$0xff] }
 0x480   :  { %v1026_v47 = vpop.xlane.xlu1 %1025  ;;  %2937 = vmatprep.subr.bf16.mxu0 %v3480_v28 }
 0x481   :  { %3074 = vrsqrt.f32 %v1049_v43  ;;  %v1041_v39 = vmul.f32 0.0078125, %v1026_v47  ;;  %2915 = vmatpush3.bf16.msra.mxu1 %v2914_v53 }
 0x482   :  { %2916 = vmatprep.subr.bf16.mxu1 %v3480_v28 }
 0x483   :  { %v1050_v19 = vadd.f32 1e-05, %v1041_v39  ;;  %2939 = vmatpush3.bf16.msra.mxu0 %v4364_v57  ;;  %v4430_v39 = vpack.c.bf16 %v1489_v32, %v1488_v22 }
 0x484   :  { %v1028_v23 = vpop.xlane.xlu0 %1027  ;;  %2940 = vmatprep.subr.bf16.mxu0 %v3480_v28 }
 0x485   :  { %3076 = vrsqrt.f32 %v1050_v19  ;;  %v1042_v51 = vmul.f32 0.0078125, %v1028_v23  ;;  %2918 = vmatpush3.bf16.msra.mxu1 %v2917_v13 }
 0x486   :  { %2919 = vmatprep.subr.bf16.mxu1 %v3480_v28 }
 0x487   :  { %v1051_v61 = vadd.f32 1e-05, %v1042_v51  ;;  %2942 = vmatpush3.bf16.msra.mxu0 %v4375_v63 }
 0x488   :  { %v1030_v26 = vpop.xlane.xlu1 %1029  ;;  %2943 = vmatprep.subr.bf16.mxu0 %v3480_v28 }
 0x489   :  { %3078 = vrsqrt.f32 %v1051_v61  ;;  %v1043_v15 = vmul.f32 0.0078125, %v1030_v26  ;;  %2921 = vmatpush3.bf16.msra.mxu1 %v2920_v54 }
 0x48a   :  { %2922 = vmatprep.subr.bf16.mxu1 %v3480_v28 }
 0x48b   :  { %v3075_v48 = vpop.eup %3074  ;;  %v1052_v45 = vadd.f32 1e-05, %v1043_v15  ;;  %2945 = vmatpush3.bf16.msra.mxu0 %v4386_v44 }
 0x48c   :  { %v1032_v16 = vpop.xlane.xlu0 %1031  ;;  %v1067_v35 = vmul.f32 %v3075_v48, %v4261_v18  ;;  %2946 = vmatprep.subr.bf16.mxu0 %v3480_v28  ;;  %v1356_v18 = vld [vmem:[#allocation19 + $0x68] sm:$0xff] }
 0x48d   :  { %3080 = vrsqrt.f32 %v1052_v45  ;;  %v1044_v40 = vmul.f32 0.0078125, %v1032_v16  ;;  %2924 = vmatpush3.bf16.msra.mxu1 %v2923_v27  ;;  %v2929_v8 = vpack.c.bf16 %v1356_v18, %v1355_v14 }
 0x48e   :  { %v1083_v7 = vmul.f32 %v4333_v49, %v1067_v35  ;;  %2925 = vmatprep.subr.bf16.mxu1 %v3480_v28 }
 0x48f   :  { %v3077_v25 = vpop.eup %3076  ;;  %v1053_v29 = vadd.f32 1e-05, %v1044_v40  ;;  %2948 = vmatpush3.bf16.msra.mxu0 %v4397_v33 }
 0x490   :  { %v1099_v24 = vadd.f32 %v4336_v5, %v1083_v7  ;;  %v1068_v17 = vmul.f32 %v3077_v25, %v4266_v46  ;;  %2949 = vmatprep.subr.bf16.mxu0 %v3480_v28  ;;  %v1357_v46 = vld [vmem:[#allocation19 + $0x70] sm:$0xff] }
 0x491   :  { %3082 = vrsqrt.f32 %v1053_v29  ;;  %2927 = vmatpush3.bf16.msra.mxu1 %v2926_v37  ;;  %v2932_v13 = vpack.c.bf16 %v1358_v31, %v1357_v46  ;;  %v2279_v37 = vld [vmem:[#allocation14] ss:$0 sm:$0xff] }
 0x492   :  { %2536 = vmatmul.mubr.f32.gmra.mrb[20].mxu1 %v1099_v24  ;;  %2577 = vmatmul.mubr.f32.gmra.mrb[2].mxu0 %v1099_v24  ;;  %v1084_v53 = vmul.f32 %v4333_v49, %v1068_v17 }
 0x493   :  { %v3079_v42 = vpop.eup %3078  ;;  %v1034_v43 = vpop.xlane.xlu1 %1033  ;;  %2538 = vmatprep.mubr.msk.f32.mxu1 %vm3481_vm8, %v3482_v34  ;;  %2579 = vmatprep.mubr.msk.f32.mxu0 %vm3481_vm8, %v3482_v34 }
 0x494   :  { %v1045_v47 = vmul.f32 0.0078125, %v1034_v43  ;;  %v1100_v56 = vadd.f32 %v4336_v5, %v1084_v53  ;;  %v1069_v59 = vmul.f32 %v3079_v42, %v4271_v6  ;;  %2928 = vmatprep.subr.bf16.mxu1 %v3480_v28  ;;  %2951 = vmatpush3.bf16.msra.mxu0 %v4413_v21 }
 0x495   :  { %2930 = vmatpush3.bf16.msra.mxu1 %v2929_v8  ;;  %2952 = vmatprep.subr.bf16.mxu0 %v3480_v28 }
 0x496   :  { %v1054_v38 = vadd.f32 1e-05, %v1045_v47  ;;  %2539 = vmatmul.mubr.f32.gmra.mrb[22].mxu1 %v1100_v56  ;;  %2580 = vmatmul.mubr.f32.gmra.mrb[4].mxu0 %v1100_v56  ;;  %v1085_v30 = vmul.f32 %v4333_v49, %v1069_v59 }
 0x497   :  { %v3081_v19 = vpop.eup %3080  ;;  %2582 = vmatprep.mubr.msk.f32.mxu0 %vm3481_vm8, %v3482_v34  ;;  %2931 = vmatprep.subr.bf16.mxu1 %v3480_v28 }
 0x498   :  { %3084 = vrsqrt.f32 %v1054_v38  ;;  %v1101_v6 = vadd.f32 %v4336_v5, %v1085_v30  ;;  %v1070_v23 = vmul.f32 %v3081_v19, %v4279_v9  ;;  %2632 = vmatprep.mubr.msk.f32.mxu1 %vm3481_vm8, %v3482_v34  ;;  %2954 = vmatpush3.bf16.msra.mxu0 %v4430_v39 }
 0x499   :  { %v1036_v50 = vpop.xlane.xlu0 %1035  ;;  %2933 = vmatpush3.bf16.msra.mxu1 %v2932_v13  ;;  %2955 = vmatprep.subr.bf16.mxu0 %v3480_v28 }
 0x49a   :  { %v1046_v52 = vmul.f32 0.0078125, %v1036_v50  ;;  %2583 = vmatmul.mubr.f32.gmra.mrb[6].mxu0 %v1101_v6  ;;  %v1086_v51 = vmul.f32 %v4333_v49, %v1070_v23  ;;  %2958 = vmatprep.subr.bf16.mxu1 %v3480_v28 }
 0x49b   :  { %v3083_v54 = vpop.eup %3082  ;;  %2585 = vmatprep.mubr.msk.f32.mxu0 %vm3481_vm8, %v3482_v34 }
 0x49c   :  { %v1055_v9 = vadd.f32 1e-05, %v1046_v52  ;;  %v1102_v55 = vadd.f32 %v4336_v5, %v1086_v51  ;;  %v1071_v60 = vmul.f32 %v3083_v54, %v4288_v41  ;;  %2633 = vmatmul.mubr.f32.vlgmr.msra.gmra.mrb[24].mxu1 %v4346_v20 }
 0x49d   :  { %2635 = vmatprep.mubr.msk.f32.mxu1 %vm3481_vm8, %v3482_v34  ;;  %2960 = vmatpush3.bf16.msra.mxu1 %v4348_v10 }
 0x49e   :  { %3086 = vrsqrt.f32 %v1055_v9  ;;  %v1038_v61 = vpop.xlane.xlu1 %1037  ;;  %2586 = vmatmul.mubr.f32.gmra.mrb[8].mxu0 %v1102_v55  ;;  %v1087_v26 = vmul.f32 %v4333_v49, %v1071_v60  ;;  %2961 = vmatprep.subr.bf16.mxu1 %v3480_v28 }
 0x49f   :  { %v1047_v36 = vmul.f32 0.0078125, %v1038_v61  ;;  %2588 = vmatprep.mubr.msk.f32.mxu0 %vm3481_vm8, %v3482_v34 }
 0x4a0   :  { %v1103_v41 = vadd.f32 %v4336_v5, %v1087_v26  ;;  %2636 = vmatmul.mubr.f32.gmra.mrb[26].mxu1 %v1099_v24 }
 0x4a1   :  { %v1056_v20 = vadd.f32 1e-05, %v1047_v36  ;;  %2638 = vmatprep.mubr.msk.f32.mxu1 %vm3481_vm8, %v3482_v34  ;;  %2963 = vmatpush3.bf16.msra.mxu1 %v4364_v57 }
 0x4a2   :  { %v3085_v2 = vpop.eup %3084  ;;  %2589 = vmatmul.mubr.f32.gmra.mrb[10].mxu0 %v1103_v41  ;;  %2964 = vmatprep.subr.bf16.mxu1 %v3480_v28 }
 0x4a3   :  { %3088 = vrsqrt.f32 %v1056_v20  ;;  %2591 = vmatprep.mubr.msk.f32.mxu0 %vm3481_vm8, %v3482_v34  ;;  %v1072_v15 = vmul.f32 %v3085_v2, %v4294_v58 }
 0x4a4   :  { %2639 = vmatmul.mubr.f32.gmra.mrb[28].mxu1 %v1100_v56 }
 0x4a5   :  { %v1088_v27 = vmul.f32 %v4333_v49, %v1072_v15  ;;  %2641 = vmatprep.mubr.msk.f32.mxu1 %vm3481_vm8, %v3482_v34  ;;  %2966 = vmatpush3.bf16.msra.mxu1 %v4375_v63 }
 0x4a6   :  { %2967 = vmatprep.subr.bf16.mxu1 %v3480_v28 }
 0x4a7   :  { %v1104_v1 = vadd.f32 %v4336_v5, %v1088_v27 }
 0x4a8   :  { %v3087_v12 = vpop.eup %3086  ;;  %2642 = vmatmul.mubr.f32.gmra.mrb[30].mxu1 %v1101_v6 }
 0x4a9   :  { %2592 = vmatmul.mubr.f32.gmra.mrb[12].mxu0 %v1104_v1  ;;  %v1073_v48 = vmul.f32 %v3087_v12, %v4306_v11  ;;  %2644 = vmatprep.mubr.msk.f32.mxu1 %vm3481_vm8, %v3482_v34 }
 0x4aa   :  { %2594 = vmatprep.mubr.msk.f32.mxu0 %vm3481_vm8, %v3482_v34  ;;  %2969 = vmatpush3.bf16.msra.mxu1 %v4386_v44 }
 0x4ab   :  { %v1089_v58 = vmul.f32 %v4333_v49, %v1073_v48  ;;  %2970 = vmatprep.subr.bf16.mxu1 %v3480_v28 }
 0x4ac   :  { %2645 = vmatmul.mubr.f32.gmra.mrb[32].mxu1 %v1102_v55 }
 0x4ad   :  { %v3089_v45 = vpop.eup %3088  ;;  %v1105_v16 = vadd.f32 %v4336_v5, %v1089_v58  ;;  %2647 = vmatprep.mubr.msk.f32.mxu1 %vm3481_vm8, %v3482_v34 }
 0x4ae   :  { %v1074_v11 = vmul.f32 %v3089_v45, %v4319_v62  ;;  %2972 = vmatpush3.bf16.msra.mxu1 %v4397_v33  ;;  %v1490_v62 = vld [vmem:[%s4683_s16 + $0x70] sm:$0xff] }
 0x4af   :  { %2595 = vmatmul.mubr.f32.gmra.mrb[14].mxu0 %v1105_v16  ;;  %2973 = vmatprep.subr.bf16.mxu1 %v3480_v28 }
 0x4b0   :  { %2597 = vmatprep.mubr.msk.f32.mxu0 %vm3481_vm8, %v3482_v34  ;;  %v1090_v35 = vmul.f32 %v4333_v49, %v1074_v11  ;;  %2648 = vmatmul.mubr.f32.gmra.mrb[34].mxu1 %v1103_v41  ;;  %v1491_v49 = vld [vmem:[%s4683_s16 + $0x78] sm:$0xff] }
 0x4b1   :  { %2650 = vmatprep.mubr.msk.f32.mxu1 %vm3481_vm8, %v3482_v34 }
 0x4b2   :  { %v1106_v40 = vadd.f32 %v4336_v5, %v1090_v35  ;;  %2975 = vmatpush3.bf16.msra.mxu1 %v4413_v21  ;;  %v2956_v5 = vpack.c.bf16 %v1491_v49, %v1490_v62 }
 0x4b3   :  { %2976 = vmatprep.subr.bf16.mxu1 %v3480_v28 }
 0x4b4   :  { %2598 = vmatmul.mubr.f32.gmra.mrb[16].mxu0 %v1106_v40  ;;  %2651 = vmatmul.mubr.f32.gmra.mrb[36].mxu1 %v1104_v1 }
 0x4b5   :  { %2653 = vmatprep.mubr.msk.f32.mxu1 %vm3481_vm8, %v3482_v34  ;;  %2691 = vmatprep.mubr.msk.f32.mxu0 %vm3481_vm8, %v3482_v34 }
 0x4b6   :  { %2978 = vmatpush3.bf16.msra.mxu1 %v4430_v39  ;;  %2957 = vmatpush3.bf16.msra.mxu0 %v2956_v5 }
 0x4b7   :  { %2979 = vmatprep.subr.bf16.mxu1 %v3480_v28  ;;  %2982 = vmatprep.subr.bf16.mxu0 %v3480_v28 }
 0x4b8   :  { %2654 = vmatmul.mubr.f32.gmra.mrb[38].mxu1 %v1105_v16 }
 0x4b9   :  { %2656 = vmatprep.mubr.msk.f32.mxu1 %vm3481_vm8, %v3482_v34 }
 0x4ba   :  { %2981 = vmatpush3.bf16.msra.mxu1 %v2956_v5 }
 0x4bb   :  { %2782 = vmatprep.subr.mxu1 %v3482_v34 }
 0x4bc   :  { %2657 = vmatmul.mubr.f32.gmra.mrb[40].mxu1 %v1106_v40 }
 0x4bd   :  { %2732 = vmatprep.mubr.msk.f32.mxu1 %vm3481_vm8, %v3482_v34 }
 0x54f   :  { %v1196_v3 = vpop.f32.mrb[18].mxu1  ;;  %v1299_v7 = vpop.f32.mrb[0].mxu0 }
 0x550   :  { %v4513_v14 = vadd.f32 %v2279_v37, %v1196_v3  ;;  %v1300_v18 = vadd.f32 %v4511_v4, %v1299_v7  ;;  %v2534_v25 = vpop.f32.mrb[19].mxu1  ;;  %v2575_v29 = vpop.f32.mrb[1].mxu0 }
 0x552   :  { %v1493_v24 = vmul.f32 %v1300_v18, %v4513_v14 }
 0x554   :  { %2692 = vmatmul.mubr.f32.vlgmr.msra.gmra.mrb[18].mxu0 %v1493_v24 }
 0x555   :  { %2984 = vmatpush3.bf16.msra.mxu0 %v4348_v10  ;;  %2694 = vmatprep.mubr.msk.f32.mxu0 %vm3481_vm8, %v3482_v34 }
 0x556   :  { %2985 = vmatprep.subr.bf16.mxu0 %v3480_v28 }
 0x559   :  { %2987 = vmatpush3.bf16.msra.mxu0 %v4364_v57 }
 0x55a   :  { %2988 = vmatprep.subr.bf16.mxu0 %v3480_v28 }
 0x55d   :  { %2990 = vmatpush3.bf16.msra.mxu0 %v4375_v63 }
 0x55e   :  { %2991 = vmatprep.subr.bf16.mxu0 %v3480_v28 }
 0x561   :  { %2993 = vmatpush3.bf16.msra.mxu0 %v4386_v44 }
 0x562   :  { %2994 = vmatprep.subr.bf16.mxu0 %v3480_v28 }
 0x565   :  { %v1201_v17 = vpop.f32.mrb[20].mxu1  ;;  %v1304_v8 = vpop.f32.mrb[2].mxu0  ;;  %2996 = vmatpush3.bf16.msra.mxu0 %v4397_v33 }
 0x566   :  { %v1202_v10 = vadd.f32 %v2279_v37, %v1201_v17  ;;  %v1305_v22 = vadd.f32 %v4511_v4, %v1304_v8  ;;  %v2537_v32 = vpop.f32.mrb[21].mxu1  ;;  %v2578_v53 = vpop.f32.mrb[3].mxu0  ;;  %2997 = vmatprep.subr.bf16.mxu0 %v3480_v28 }
 0x568   :  { %v1494_v57 = vmul.f32 %v1305_v22, %v1202_v10 }
 0x569   :  { %v1206_v46 = vpop.f32.mrb[22].mxu1  ;;  %v1309_v63 = vpop.f32.mrb[4].mxu0  ;;  %2999 = vmatpush3.bf16.msra.mxu0 %v4413_v21 }
 0x56a   :  { %v1207_v31 = vadd.f32 %v2279_v37, %v1206_v46  ;;  %v1310_v44 = vadd.f32 %v4511_v4, %v1309_v63  ;;  %v2540_v42 = vpop.f32.mrb[23].mxu1  ;;  %v2581_v43 = vpop.f32.mrb[5].mxu0  ;;  %2695 = vmatmul.mubr.f32.gmra.mrb[20].mxu0 %v1494_v57  ;;  %3000 = vmatprep.subr.bf16.mxu0 %v3480_v28 }
 0x56b   :  { %2697 = vmatprep.mubr.msk.f32.mxu0 %vm3481_vm8, %v3482_v34 }
 0x56c   :  { %v1495_v33 = vmul.f32 %v1310_v44, %v1207_v31 }
 0x56d   :  { %v1314_v47 = vpop.f32.mrb[6].mxu0  ;;  %3002 = vmatpush3.bf16.msra.mxu0 %v4430_v39 }
 0x56e   :  { %v1315_v56 = vadd.f32 %v4511_v4, %v1314_v47  ;;  %v2584_v59 = vpop.f32.mrb[7].mxu0  ;;  %2698 = vmatmul.mubr.f32.gmra.mrb[22].mxu0 %v1495_v33  ;;  %3003 = vmatprep.subr.bf16.mxu0 %v3480_v28 }
 0x56f   :  { %v4538_v21 = vpop.f32.mrb[24].mxu1  ;;  %2773 = vmatprep.mubr.msk.f32.mxu0 %vm3481_vm8, %v3482_v34 }
 0x570   :  { %v1579_v13 = vmul.f32 %v1315_v56, %v4513_v14  ;;  %v2634_v38 = vpop.f32.mrb[25].mxu1 }
 0x571   :  { %v1319_v30 = vpop.f32.mrb[8].mxu0  ;;  %3005 = vmatpush3.bf16.msra.mxu0 %v2956_v5 }
 0x572   :  { %v1320_v19 = vadd.f32 %v4511_v4, %v1319_v30  ;;  %v2587_v6 = vpop.f32.mrb[9].mxu0  ;;  %2733 = vmatmul.mubr.f32.vlgmr.msra.gmra.mrb[42].mxu1 %v1579_v13  ;;  %2793 = vmatprep.subr.mxu0 %v3482_v34 }
 0x573   :  { %2735 = vmatprep.mubr.msk.f32.mxu1 %vm3481_vm8, %v3482_v34  ;;  %v4547_v39 = vpop.f32.mrb[26].mxu1 }
 0x574   :  { %v1580_v23 = vmul.f32 %v1320_v19, %v1202_v10  ;;  %v2637_v50 = vpop.f32.mrb[27].mxu1 }
 0x575   :  { %v1324_v52 = vpop.f32.mrb[10].mxu0 }
 0x576   :  { %v1325_v51 = vadd.f32 %v4511_v4, %v1324_v52  ;;  %v2590_v54 = vpop.f32.mrb[11].mxu0  ;;  %2736 = vmatmul.mubr.f32.gmra.mrb[44].mxu1 %v1580_v23 }
 0x577   :  { %2738 = vmatprep.mubr.msk.f32.mxu1 %vm3481_vm8, %v3482_v34  ;;  %v4552_v9 = vpop.f32.mrb[28].mxu1 }
 0x578   :  { %v1581_v55 = vmul.f32 %v1325_v51, %v1207_v31  ;;  %v2640_v60 = vpop.f32.mrb[29].mxu1 }
 0x57a   :  { %2739 = vmatmul.mubr.f32.gmra.mrb[46].mxu1 %v1581_v55 }
 0x57b   :  { %v4554_v61 = vpop.f32.mrb[30].mxu1  ;;  %2784 = vmatprep.mubr.msk.f32.mxu1 %vm3481_vm8, %v3482_v34 }
 0x57c   :  { %v1329_v26 = vpop.f32.mrb[12].mxu0  ;;  %v2643_v36 = vpop.f32.mrb[31].mxu1 }
 0x57d   :  { %v1330_v41 = vadd.f32 %v4511_v4, %v1329_v26  ;;  %v2593_v20 = vpop.f32.mrb[13].mxu0 }
 0x57f   :  { %v1665_v2 = vmul.f32 %v1330_v41, %v4513_v14  ;;  %v4560_v15 = vpop.f32.mrb[32].mxu1 }
 0x580   :  { %v2646_v27 = vpop.f32.mrb[33].mxu1 }
 0x581   :  { %2774 = vmatmul.mubr.f32.vlgmr.msra.gmra.mrb[24].mxu0 %v1665_v2 }
 0x582   :  { %v1334_v1 = vpop.f32.mrb[14].mxu0  ;;  %2776 = vmatprep.mubr.msk.f32.mxu0 %vm3481_vm8, %v3482_v34 }
 0x583   :  { %v1335_v12 = vadd.f32 %v4511_v4, %v1334_v1  ;;  %v2596_v48 = vpop.f32.mrb[15].mxu0  ;;  %v4565_v58 = vpop.f32.mrb[34].mxu1 }
 0x584   :  { %v2649_v45 = vpop.f32.mrb[35].mxu1 }
 0x585   :  { %v1666_v16 = vmul.f32 %v1335_v12, %v1202_v10 }
 0x587   :  { %v1339_v11 = vpop.f32.mrb[16].mxu0  ;;  %2777 = vmatmul.mubr.f32.gmra.mrb[26].mxu0 %v1666_v16  ;;  %v4567_v35 = vpop.f32.mrb[36].mxu1 }
 0x588   :  { %v1340_v40 = vadd.f32 %v4511_v4, %v1339_v11  ;;  %v2599_v62 = vpop.f32.mrb[17].mxu0  ;;  %2779 = vmatprep.mubr.msk.f32.mxu0 %vm3481_vm8, %v3482_v34  ;;  %v2652_v49 = vpop.f32.mrb[37].mxu1  ;;  %v4581_v4 = vld [vmem:[%s4684_s17] sm:$0xf]  ;;  %s3483_s17 = smov 127  }
 0x589   :  { %2783 = vmatpush3.msk.msra.mxu1 %vm1806_vm9, %v4581_v4  ;;  %2794 = vmatpush3.msk.msra.mxu0 %vm1806_vm9, %v4581_v4 }
 0x58a   :  { %v1667_v5 = vmul.f32 %v1340_v40, %v1207_v31  ;;  %2804 = vmatprep.subr.mxu1 %v3482_v34  ;;  %3006 = vmatprep.subr.bf16.mxu0 %v3480_v28 }
 0x58b   :  { %v4572_v37 = vpop.f32.mrb[38].mxu1 }
 0x58c   :  { %2780 = vmatmul.mubr.f32.gmra.mrb[28].mxu0 %v1667_v5  ;;  %v2655_v3 = vpop.f32.mrb[39].mxu1 }
 0x58d   :  { %2795 = vmatprep.mubr.msk.f32.mxu0 %vm3481_vm8, %v3482_v34 }
 0x58f   :  { %v4576_v7 = vpop.f32.mrb[40].mxu1 }
 0x590   :  { %v2658_v14 = vpop.f32.mrb[41].mxu1 }
 0x627   :  { %v1562_v18 = vpop.f32.mrb[18].mxu0 }
 0x628   :  { %v2693_v25 = vpop.f32.mrb[19].mxu0  ;;  %v1576_v22 = vmul.f32 0.17677669, %v1562_v18 }
 0x63d   :  { %v1567_v29 = vpop.f32.mrb[20].mxu0 }
 0x63e   :  { %v2696_v24 = vpop.f32.mrb[21].mxu0  ;;  %v1577_v63 = vmul.f32 0.17677669, %v1567_v29 }
 0x641   :  { %v1572_v17 = vpop.f32.mrb[22].mxu0 }
 0x642   :  { %v2699_v8 = vpop.f32.mrb[23].mxu0  ;;  %v1578_v33 = vmul.f32 0.17677669, %v1572_v17 }
 0x645   :  { %v1648_v10 = vpop.f32.mrb[42].mxu1 }
 0x646   :  { %v1662_v32 = vmul.f32 0.17677669, %v1648_v10  ;;  %v2734_v53 = vpop.f32.mrb[43].mxu1 }
 0x648   :  { %v1751_v57 = vmax.f32 %v1576_v22, %v1662_v32 }
 0x649   :  { %v1653_v46 = vpop.f32.mrb[44].mxu1 }
 0x64a   :  { %v1663_v31 = vmul.f32 0.17677669, %v1653_v46  ;;  %v2737_v44 = vpop.f32.mrb[45].mxu1 }
 0x64b   :  { %v2093_v44 = vld [vmem:[#allocation22 + $0x8] sm:$0xff] }
 0x64c   :  { %v1752_v42 = vmax.f32 %v1577_v63, %v1663_v31 }
 0x64d   :  { %v1658_v43 = vpop.f32.mrb[46].mxu1 }
 0x64e   :  { %v1664_v47 = vmul.f32 0.17677669, %v1658_v43  ;;  %v2740_v56 = vpop.f32.mrb[47].mxu1 }
 0x650   :  { %v1753_v59 = vmax.f32 %v1578_v33, %v1664_v47 }
 0x654   :  { %v1734_v13 = vpop.f32.mrb[24].mxu0 }
 0x655   :  { %v1748_v38 = vmul.f32 0.17677669, %v1734_v13  ;;  %v2775_v30 = vpop.f32.mrb[25].mxu0 }
 0x656   :  { %v2095_v30 = vld [vmem:[#allocation22 + $0x18] sm:$0xff] }
 0x657   :  { %v1754_v19 = vmax.f32 %v1751_v57, %v1748_v38 }
 0x659   :  { %v1757_v6 = vsub.f32 %v1576_v22, %v1754_v19  ;;  %v1766_v23 = vsub.f32 %v1662_v32, %v1754_v19  ;;  %v1775_v50 = vsub.f32 %v1748_v38, %v1754_v19  ;;  %v2094_v38 = vld [vmem:[#allocation22 + $0x10] sm:$0xff] }
 0x65a   :  { %v1739_v52 = vpop.f32.mrb[26].mxu0  ;;  %v3010_v19 = vpack.c.bf16 %v2095_v30, %v2094_v38 }
 0x65b   :  { %v1760_v51 = vmul.f32 1.442695, %v1757_v6  ;;  %v1769_v54 = vmul.f32 1.442695, %v1766_v23  ;;  %v1778_v55 = vmul.f32 1.442695, %v1775_v50 }
 0x65c   :  { %v1749_v60 = vmul.f32 0.17677669, %v1739_v52  ;;  %v2778_v26 = vpop.f32.mrb[27].mxu0  ;;  %v2096_v6 = vld [vmem:[#allocation22 + $0x20] sm:$0xff]  ;;  %v2097_v23 = vld [vmem:[#allocation22 + $0x28] sm:$0xff] }
 0x65d   :  { %3090 = vpow2.f32 %v1760_v51 }
 0x65e   :  { %3092 = vpow2.f32 %v1769_v54  ;;  %v1755_v36 = vmax.f32 %v1752_v42, %v1749_v60 }
 0x65f   :  { %3094 = vpow2.f32 %v1778_v55  ;;  %v1744_v41 = vpop.f32.mrb[28].mxu0  ;;  %v3013_v55 = vpack.c.bf16 %v2097_v23, %v2096_v6 }
 0x660   :  { %v1758_v20 = vsub.f32 %v1577_v63, %v1755_v36  ;;  %v1767_v2 = vsub.f32 %v1663_v31, %v1755_v36  ;;  %v1776_v27 = vsub.f32 %v1749_v60, %v1755_v36  ;;  %v1750_v1 = vmul.f32 0.17677669, %v1744_v41  ;;  %v2781_v12 = vpop.f32.mrb[29].mxu0  ;;  %v2092_v31 = vld [vmem:[#allocation22] sm:$0xff]  ;;  %v2099_v60 = vld [vmem:[#allocation22 + $0x38] sm:$0xff] }
 0x662   :  { %v1762_v48 = vmul.f32 1.442695, %v1758_v20  ;;  %v1771_v45 = vmul.f32 1.442695, %v1767_v2  ;;  %v1756_v16 = vmax.f32 %v1753_v59, %v1750_v1  ;;  %v1780_v11 = vmul.f32 1.442695, %v1776_v27 }
 0x663   :  { %v2100_v27 = vld [vmem:[#allocation22 + $0x40] sm:$0xff] }
 0x664   :  { %3096 = vpow2.f32 %v1762_v48  ;;  %v1759_v40 = vsub.f32 %v1578_v33, %v1756_v16  ;;  %v1768_v62 = vsub.f32 %v1664_v47, %v1756_v16  ;;  %v1777_v49 = vsub.f32 %v1750_v1, %v1756_v16  ;;  %v2101_v1 = vld [vmem:[#allocation22 + $0x48] sm:$0xff]  ;;  %v2102_v48 = vld [vmem:[#allocation22 + $0x50] sm:$0xff] }
 0x665   :  { %3098 = vpow2.f32 %v1771_v45  ;;  %v3007_v47 = vpack.c.bf16 %v2093_v44, %v2092_v31  ;;  %v3019_v12 = vpack.c.bf16 %v2101_v1, %v2100_v27  ;;  %v2103_v45 = vld [vmem:[#allocation22 + $0x58] sm:$0xff] }
 0x666   :  { %v1764_v5 = vmul.f32 1.442695, %v1759_v40  ;;  %v1773_v3 = vmul.f32 1.442695, %v1768_v62  ;;  %3100 = vpow2.f32 %v1780_v11  ;;  %v1782_v18 = vmul.f32 1.442695, %v1777_v49 }
 0x667   :  { %v3091_v14 = vpop.eup %3090  ;;  %v3022_v16 = vpack.c.bf16 %v2103_v45, %v2102_v48  ;;  %v2104_v11 = vld [vmem:[#allocation22 + $0x60] sm:$0xff]  ;;  %v2105_v40 = vld [vmem:[#allocation22 + $0x68] sm:$0xff]  ;;  %v2106_v49 = vld [vmem:[#allocation22 + $0x70] sm:$0xff] }
 0x668   :  { %v3093_v25 = vpop.eup %3092  ;;  %3102 = vpow2.f32 %v1764_v5  ;;  %v3025_v62 = vpack.c.bf16 %v2105_v40, %v2104_v11  ;;  %v2107_v5 = vld [vmem:[#allocation22 + $0x78] sm:$0xff] }
 0x669   :  { %v3095_v29 = vpop.eup %3094  ;;  %v1784_v24 = vadd.f32 %v3093_v25, %v3091_v14  ;;  %3104 = vpow2.f32 %v1773_v3  ;;  %v3028_v3 = vpack.c.bf16 %v2107_v5, %v2106_v49 }
 0x66a   :  { %3106 = vpow2.f32 %v1782_v18 }
 0x66b   :  { %v1787_v17 = vadd.f32 %v3095_v29, %v1784_v24 }
 0x66d   :  { %3108 = vrcp.f32 %v1787_v17 }
 0x66e   :  { %v3097_v8 = vpop.eup %3096 }
 0x66f   :  { %v3099_v10 = vpop.eup %3098 }
 0x670   :  { %v1785_v22 = vadd.f32 %v3099_v10, %v3097_v8  ;;  %v3101_v32 = vpop.eup %3100 }
 0x672   :  { %v3103_v53 = vpop.eup %3102  ;;  %v1788_v57 = vadd.f32 %v3101_v32, %v1785_v22 }
 0x673   :  { %v3105_v46 = vpop.eup %3104 }
 0x674   :  { %3110 = vrcp.f32 %v1788_v57  ;;  %v1786_v63 = vadd.f32 %v3105_v46, %v3103_v53  ;;  %v3107_v42 = vpop.eup %3106 }
 0x676   :  { %v1789_v43 = vadd.f32 %v3107_v42, %v1786_v63 }
 0x677   :  { %v3109_v33 = vpop.eup %3108 }
 0x678   :  { %v1994_v56 = vmul.f32 %v3109_v33, %v3095_v29  ;;  %3112 = vrcp.f32 %v1789_v43  ;;  %v1793_v59 = vmul.f32 %v3109_v33, %v3091_v14  ;;  %v1896_v13 = vmul.f32 %v3109_v33, %v3093_v25  ;;  %v2281_v14 = vld [vmem:[#allocation20] ss:$0 sm:$0xff] }
 0x679   :  { %v1433_v18 = vadd.f32 %v2281_v14, %v4538_v21  ;;  %v1448_v25 = vadd.f32 %v2281_v14, %v4554_v61  ;;  %v1443_v21 = vadd.f32 %v2281_v14, %v4552_v9  ;;  %v1458_v61 = vadd.f32 %v2281_v14, %v4565_v58 }
 0x67a   :  { %2785 = vmatmul.mubr.msk.f32.vlgmr.msra.gmra.mrb[48].mxu1 %vm1796_vm10, %v1793_v59  ;;  %2796 = vmatmul.mubr.msk.f32.vlgmr.msra.gmra.mrb[30].mxu0 %vm1796_vm10, %v1896_v13  ;;  %v1468_v23 = vadd.f32 %v2281_v14, %v4572_v37  ;;  %v1473_v58 = vadd.f32 %v2281_v14, %v4576_v7  ;;  %v2294_v37 = vld [vmem:[#allocation23] ss:$0 sm:$0xff] }
 0x67b   :  { %2805 = vmatpush3.msk.msra.mxu1 %vm1806_vm9, %v4581_v4  ;;  %2787 = vmatprep.mubr.msk.f32.mxu1 %vm3481_vm8, %v3482_v34  ;;  %v2098_v4 = vld [vmem:[#allocation22 + $0x30] sm:$0xff] }
 0x67c   :  { %2798 = vmatprep.mubr.msk.f32.mxu0 %vm3481_vm8, %v3482_v34  ;;  %3008 = vmatpush3.bf16.msra.mxu0 %v3007_v47  ;;  %v3016_v2 = vpack.c.bf16 %v2099_v60, %v2098_v4 }
 0x67d   :  { %3009 = vmatprep.subr.bf16.mxu0 %v3480_v28 }
 0x67e   :  { %v3111_v50 = vpop.eup %3110 }
 0x67f   :  { %v1794_v52 = vmul.f32 %v3111_v50, %v3097_v8  ;;  %v1897_v51 = vmul.f32 %v3111_v50, %v3099_v10  ;;  %v1995_v54 = vmul.f32 %v3111_v50, %v3101_v32 }
 0x680   :  { %3011 = vmatpush3.bf16.msra.mxu0 %v3010_v19 }
 0x681   :  { %2788 = vmatmul.mubr.msk.f32.gmra.mrb[50].mxu1 %vm1796_vm10, %v1794_v52  ;;  %2799 = vmatmul.mubr.msk.f32.gmra.mrb[32].mxu0 %vm1796_vm10, %v1897_v51 }
 0x682   :  { %v3113_v26 = vpop.eup %3112  ;;  %2790 = vmatprep.mubr.msk.f32.mxu1 %vm3481_vm8, %v3482_v34  ;;  %2801 = vmatprep.mubr.msk.f32.mxu0 %vm3481_vm8, %v3482_v34 }
 0x683   :  { %v1795_v36 = vmul.f32 %v3113_v26, %v3103_v53  ;;  %v1898_v41 = vmul.f32 %v3113_v26, %v3105_v46  ;;  %v1996_v20 = vmul.f32 %v3113_v26, %v3107_v42  ;;  %3012 = vmatprep.subr.bf16.mxu0 %v3480_v28  ;;  %v1438_v53 = vadd.f32 %v2281_v14, %v4547_v39 }
 0x684   :  { %3014 = vmatpush3.bf16.msra.mxu0 %v3013_v55  ;;  %v1463_v39 = vadd.f32 %v2281_v14, %v4567_v35 }
 0x685   :  { %2791 = vmatmul.mubr.msk.f32.gmra.mrb[52].mxu1 %vm1796_vm10, %v1795_v36  ;;  %2802 = vmatmul.mubr.msk.f32.gmra.mrb[34].mxu0 %vm1796_vm10, %v1898_v41 }
 0x686   :  { %2806 = vmatprep.mubr.msk.f32.mxu1 %vm3481_vm8, %v3482_v34  ;;  %3015 = vmatprep.subr.bf16.mxu0 %v3480_v28 }
 0x687   :  { %2847 = vmatprep.mubr.msk.f32.mxu0 %vm3481_vm8, %v3482_v34 }
 0x688   :  { %3017 = vmatpush3.bf16.msra.mxu0 %v3016_v2 }
 0x689   :  { %2807 = vmatmul.mubr.msk.f32.vlgmr.msra.gmra.mrb[54].mxu1 %vm1796_vm10, %v1994_v56  ;;  %3018 = vmatprep.subr.bf16.mxu0 %v3480_v28 }
 0x68a   :  { %2809 = vmatprep.mubr.msk.f32.mxu1 %vm3481_vm8, %v3482_v34 }
 0x68c   :  { %3020 = vmatpush3.bf16.msra.mxu0 %v3019_v12 }
 0x68d   :  { %2810 = vmatmul.mubr.msk.f32.gmra.mrb[56].mxu1 %vm1796_vm10, %v1995_v54  ;;  %3021 = vmatprep.subr.bf16.mxu0 %v3480_v28 }
 0x68e   :  { %2812 = vmatprep.mubr.msk.f32.mxu1 %vm3481_vm8, %v3482_v34 }
 0x690   :  { %3023 = vmatpush3.bf16.msra.mxu0 %v3022_v16 }
 0x691   :  { %2813 = vmatmul.mubr.msk.f32.gmra.mrb[58].mxu1 %vm1796_vm10, %v1996_v20  ;;  %3024 = vmatprep.subr.bf16.mxu0 %v3480_v28 }
 0x694   :  { %3026 = vmatpush3.bf16.msra.mxu0 %v3025_v62 }
 0x695   :  { %3027 = vmatprep.subr.bf16.mxu0 %v3480_v28  ;;  %v1453_v28 = vadd.f32 %v2281_v14, %v4560_v15 }
 0x698   :  { %3029 = vmatpush3.bf16.msra.mxu0 %v3028_v3 }
 0x74d   :  { %v1876_v29 = vpop.f32.mrb[48].mxu1  ;;  %v1974_v24 = vpop.f32.mrb[30].mxu0 }
 0x74e   :  { %v1890_v17 = vmul.f32 %v1876_v29, %v1433_v18  ;;  %v1988_v8 = vmul.f32 %v1974_v24, %v1448_v25  ;;  %v2786_v10 = vpop.f32.mrb[49].mxu1  ;;  %v2797_v22 = vpop.f32.mrb[31].mxu0  ;;  %v2232_v18 = vld [vmem:[%s4685_s18] sm:$0xff] }
 0x750   :  { %v1991_v32 = vadd.f32 %v1988_v8, %v1890_v17 }
 0x754   :  { %v1881_v57 = vpop.f32.mrb[50].mxu1  ;;  %v1979_v46 = vpop.f32.mrb[32].mxu0 }
 0x755   :  { %v1891_v63 = vmul.f32 %v1881_v57, %v1438_v53  ;;  %v1989_v31 = vmul.f32 %v1979_v46, %v1453_v28  ;;  %v2789_v44 = vpop.f32.mrb[51].mxu1  ;;  %v2800_v42 = vpop.f32.mrb[33].mxu0  ;;  %v2233_v53 = vld [vmem:[%s4685_s18 + $0x8] sm:$0xff] }
 0x757   :  { %v1992_v43 = vadd.f32 %v1989_v31, %v1891_v63 }
 0x758   :  { %v1886_v33 = vpop.f32.mrb[52].mxu1  ;;  %v1984_v47 = vpop.f32.mrb[34].mxu0 }
 0x759   :  { %v1892_v56 = vmul.f32 %v1886_v33, %v1443_v21  ;;  %v1990_v59 = vmul.f32 %v1984_v47, %v1458_v61  ;;  %v2792_v13 = vpop.f32.mrb[53].mxu1  ;;  %v2803_v38 = vpop.f32.mrb[35].mxu0 }
 0x75b   :  { %v1993_v15 = vadd.f32 %v1990_v59, %v1892_v56 }
 0x75c   :  { %v2072_v30 = vpop.f32.mrb[54].mxu1 }
 0x75d   :  { %v2086_v19 = vmul.f32 %v2072_v30, %v1463_v39  ;;  %v2808_v6 = vpop.f32.mrb[55].mxu1 }
 0x75f   :  { %v2089_v50 = vadd.f32 %v2086_v19, %v1991_v32 }
 0x760   :  { %v2077_v52 = vpop.f32.mrb[56].mxu1 }
 0x761   :  { %v2087_v9 = vmul.f32 %v2077_v52, %v1468_v23  ;;  %v2811_v51 = vpop.f32.mrb[57].mxu1  ;;  %2848 = vmatmul.mubr.f32.vlgmr.msra.gmra.mrb[36].mxu0 %v2089_v50 }
 0x762   :  { %2850 = vmatprep.mubr.msk.f32.mxu0 %vm3481_vm8, %v3482_v34 }
 0x763   :  { %v2090_v54 = vadd.f32 %v2087_v9, %v1992_v43  ;;  %v2234_v43 = vld [vmem:[%s4685_s18 + $0x10] sm:$0xff] }
 0x764   :  { %v2082_v55 = vpop.f32.mrb[58].mxu1 }
 0x765   :  { %v2088_v4 = vmul.f32 %v2082_v55, %v1473_v58  ;;  %v2814_v35 = vpop.f32.mrb[59].mxu1  ;;  %2851 = vmatmul.mubr.f32.gmra.mrb[38].mxu0 %v2090_v54 }
 0x766   :  { %2853 = vmatprep.mubr.msk.f32.mxu0 %vm3481_vm8, %v3482_v34  ;;  %v2208_v34 = vand.u32 127, %v378_v0 }
 0x767   :  { %v2091_v60 = vadd.f32 %v2088_v4, %v1993_v15 }
 0x768   :  { %vm2209_vm11 = vcmp.eq.s32.totalorder %v2208_v34, 0  ;;  %vm2213_vm12 = vcmp.eq.s32.totalorder %v2208_v34, 127 }
 0x769   :  { %2854 = vmatmul.mubr.f32.gmra.mrb[40].mxu0 %v2091_v60 }
 0x834   :  { %v2181_v26 = vpop.f32.mrb[36].mxu0 }
 0x835   :  { %v2182_v36 = vadd.f32 %v2294_v37, %v2181_v26  ;;  %v2849_v41 = vpop.f32.mrb[37].mxu0 }
 0x837   :  { %2201 = vrot.lane.b32.xlu1 %v2182_v36, %s3483_s17  ;;  %2195 = vrot.lane.b32.xlu0 %v2182_v36, %s3484_s20  ;;  %v2217_v40 = vmul.f32 1.9923275, %v2182_v36 }
 0x838   :  { %v2186_v20 = vpop.f32.mrb[38].mxu0 }
 0x839   :  { %v2187_v7 = vadd.f32 %v2294_v37, %v2186_v20  ;;  %v2852_v2 = vpop.f32.mrb[39].mxu0 }
 0x83b   :  { %2203 = vrot.lane.b32.xlu0 %v2187_v7, %s3483_s17  ;;  %2197 = vrot.lane.b32.xlu1 %v2187_v7, %s3484_s20  ;;  %v2218_v29 = vmul.f32 1.9923275, %v2187_v7 }
 0x83c   :  { %v2191_v27 = vpop.f32.mrb[40].mxu0 }
 0x83d   :  { %v2192_v1 = vadd.f32 %v2294_v37, %v2191_v27  ;;  %v2855_v12 = vpop.f32.mrb[41].mxu0 }
 0x83f   :  { %2199 = vrot.lane.b32.xlu1 %v2192_v1, %s3484_s20  ;;  %v2219_v44 = vmul.f32 1.9923275, %v2192_v1 }
 0x843   :  { %2205 = vrot.lane.b32.xlu1 %v2192_v1, %s3483_s17 }
 0x8a9   :  { %v2202_v48 = vpop.permute.xlu1 %2201  ;;  %v2196_v45 = vpop.permute.xlu0 %2195 }
 0x8aa   :  { %v2210_v16 = vsel %vm2209_vm11, %v2202_v48, %v2196_v45  ;;  %v2214_v11 = vsel %vm2213_vm12, %v2196_v45, %v2202_v48 }
 0x8ab   :  { %v2220_v62 = vmul.f32 0.0038362588, %v2210_v16  ;;  %v2226_v5 = vmul.f32 0.0038362588, %v2214_v11 }
 0x8ad   :  { %v2223_v49 = vadd.f32 %v2220_v62, %v2217_v40  ;;  %v2204_v3 = vpop.permute.xlu0 %2203  ;;  %v2198_v14 = vpop.permute.xlu1 %2197 }
 0x8ae   :  { %v2211_v0 = vsel %vm2209_vm11, %v2204_v3, %v2198_v14  ;;  %v2215_v25 = vsel %vm2213_vm12, %v2198_v14, %v2204_v3 }
 0x8af   :  { %v2229_v24 = vadd.f32 %v2226_v5, %v2223_v49  ;;  %v2221_v17 = vmul.f32 0.0038362588, %v2211_v0  ;;  %v2227_v22 = vmul.f32 0.0038362588, %v2215_v25 }
 0x8b1   :  { %v2235_v8 = vadd.f32 %v2232_v18, %v2229_v24  ;;  %v2224_v10 = vadd.f32 %v2221_v17, %v2218_v29  ;;  %v2200_v32 = vpop.permute.xlu1 %2199 }
 0x8b3   :  { %2238 = vst [vmem:[#allocation25] sm:$0xff] %v2235_v8  ;;  %v2230_v28 = vadd.f32 %v2227_v22, %v2224_v10 }
 0x8b5   :  { %v2236_v57 = vadd.f32 %v2233_v53, %v2230_v28  ;;  %v2206_v46 = vpop.permute.xlu1 %2205 }
 0x8b6   :  { %v2212_v63 = vsel %vm2209_vm11, %v2206_v46, %v2200_v32  ;;  %v2216_v31 = vsel %vm2213_vm12, %v2200_v32, %v2206_v46 }
 0x8b7   :  { %2239 = vst [vmem:[#allocation25 + $0x8] sm:$0xff] %v2236_v57  ;;  %v2222_v42 = vmul.f32 0.0038362588, %v2212_v63  ;;  %v2228_v61 = vmul.f32 0.0038362588, %v2216_v31 }
 0x8b9   :  { %v2225_v21 = vadd.f32 %v2222_v42, %v2219_v44 }
 0x8bb   :  { %v2231_v33 = vadd.f32 %v2228_v61, %v2225_v21 }
 0x8bd   :  { %v2237_v47 = vadd.f32 %v2234_v43, %v2231_v33 }
 0x8bf   :  { %2240 = vst [vmem:[#allocation25 + $0x10] sm:$0xff] %v2237_v47 }
 0x8c0   :  { %3433 = shalt.err (!%p3430_p4)
}
 0x8c1   :  { %s3434_s5 = scalar_lea.hbm %s4686_s19, 384 }
 0x8c2   :  { %p3435_p5 = scmp.ne.s32.totalorder %s4686_s19, %s3434_s5  ;;  %p3438_p6 = scmp.lt.u32.totalorder %s3434_s5, %s4686_s19 }
 0x8c4   :  { %p3440_p7 = pnand %p3438_p6, %p3435_p5 }
 0x8c6   :  { %3443 = shalt.err (!%p3440_p7)
}
 0x8c7   :  { %2252 = dma.vmem_to_hbm [thread:$0]  %s2247_s22, 384, %s4686_s19, [#allocation4], %s3475_s7, %s3475_s7, %s3476_s21  }
 0x8c8   :  { %3460 = dma.done.wait [#allocation4], 384  }
 0x8c9   :  { %3461 = vsyncadd [#allocation4], 4294966912 }
 0x8ca   :  { %2256 = vsyncpa [#allocation3], 1 }
 0x8cb   :  { %2257 = vsyncpa [#allocation6], 1 }
 0x8cc   :  { %2258 = vsyncpa [#allocation9], 1 }
 0x8cd   :  { %2259 = vsyncpa [#allocation12], 1 }
 0x8ce   :  { %2260 = vsyncpa [#allocation15], 1 }
 0x8cf   :  { %2261 = vsyncpa [#allocation18], 1 }
 0x8d0   :  { %2262 = vsyncpa [#allocation21], 1 }
 0x8d1   :  { %2263 = vsyncpa [#allocation24], 1 }
 0x8d2   :  { %2264 = vsyncpa [#allocation4], 1 }

</bundles_post_ra>
